<compile_context>
chip_gen: v6e
topology: v6e:2x2x1
jax: 0.10.0
libtpu: 0.0.40
codegen_flags: <defaults>
</compile_context>

<pallas_src>
import jax
import jax.numpy as jnp
from jax.experimental import pallas as pl
from jax.experimental.pallas import tpu as pltpu


def _round_up(x, m):
    return (x + m - 1) // m * m


def _pad2(a, rows, cols):
    return jnp.pad(a, ((0, rows - a.shape[0]), (0, cols - a.shape[1])))


def _pick_chunk(seq_len, max_chunk):
    """Time-chunk length: whole sequence if small, else a /8 divisor of S."""
    if seq_len <= max_chunk:
        return seq_len
    start = max_chunk - (max_chunk % 8)
    for t in range(start, 0, -8):
        if seq_len % t == 0:
            return t
    return seq_len  # fall back to a single chunk (always BlockSpec-legal)


def rnn_kernel(x_ref, wx0_ref, b0_ref, wh0_ref,
               wx1_ref, wh1_ref, b1_ref,
               wfc1_ref, wfc2_ref, bfc_ref,
               out_ref, h1_scr, h2_scr):
    """Grid axis = time chunk (sequential / 'arbitrary').

    x_ref:   (Bp, T_CHUNK, Ep) one chunk of the embedded sequence
    h1_scr / h2_scr: (Bp, Hp) VMEM scratch, persist across chunks
    out_ref: (Bp, Op) written only on the last chunk
    """
    c = pl.program_id(0)

    # h_0 = zeros  (matches torch.zeros(2, batch, hidden))
    @pl.when(c == 0)
    def _():
        h1_scr[...] = jnp.zeros_like(h1_scr)
        h2_scr[...] = jnp.zeros_like(h2_scr)

    bp, t_chunk, ep = x_ref.shape
    hp = h1_scr.shape[-1]

    # Hoisted layer-0 input projection for the whole chunk: one big MXU matmul
    # with the bias folded in, instead of one tiny dot + add per timestep.
    x2d = x_ref[...].reshape(bp * t_chunk, ep)
    xproj = (jnp.dot(x2d, wx0_ref[...], preferred_element_type=jnp.float32)
             + b0_ref[...]).reshape(bp, t_chunk, hp)

    wh0 = wh0_ref[...]
    wx1 = wx1_ref[...]
    wh1 = wh1_ref[...]
    b1 = b1_ref[...]

    h1 = h1_scr[...]
    h2 = h2_scr[...]
    # t_chunk is static -> fully unrolled serial recurrence with static slices.
    for t in range(t_chunk):
        h1 = jnp.tanh(xproj[:, t, :]
                      + jnp.dot(h1, wh0, preferred_element_type=jnp.float32))
        h2 = jnp.tanh(jnp.dot(h1, wx1, preferred_element_type=jnp.float32)
                      + jnp.dot(h2, wh1, preferred_element_type=jnp.float32)
                      + b1)
    h1_scr[...] = h1
    h2_scr[...] = h2

    # Last chunk: logits = [h1_n ; h2_n] @ Wfc + bfc  (split into two matmuls).
    @pl.when(c == pl.num_programs(0) - 1)
    def _():
        logits = (jnp.dot(h1, wfc1_ref[...], preferred_element_type=jnp.float32)
                  + jnp.dot(h2, wfc2_ref[...], preferred_element_type=jnp.float32)
                  + bfc_ref[...])
        out_ref[...] = logits.astype(out_ref.dtype)


def vanilla_rnn_forward(token_ids, params, max_chunk=64):
    """token_ids: (batch, seq) int32.  Returns logits (batch, output_size)."""
    # Embedding gather is glue (pure indexing) done in XLA.  No transpose:
    # the kernel indexes the (B, S, E) layout directly via its BlockSpec.
    emb = params["embedding"][token_ids].astype(jnp.float32)   # (B, S, E)
    B, S, E = emb.shape
    H = params["wh0"].shape[0]
    O = params["bfc"].shape[-1]

    # Pad to MXU / vreg friendly shapes (zeros are mathematically inert here).
    Bp = _round_up(B, 8)
    Ep = _round_up(E, 128)
    Hp = _round_up(H, 128)
    Op = _round_up(O, 128)

    x = jnp.pad(emb, ((0, Bp - B), (0, 0), (0, Ep - E)))        # (Bp, S, Ep)
    wx0 = _pad2(params["wx0"], Ep, Hp)
    b0 = _pad2(params["b0"], 1, Hp)
    wh0 = _pad2(params["wh0"], Hp, Hp)
    wx1 = _pad2(params["wx1"], Hp, Hp)
    wh1 = _pad2(params["wh1"], Hp, Hp)
    b1 = _pad2(params["b1"], 1, Hp)
    wfc1 = _pad2(params["wfc1"], Hp, Op)
    wfc2 = _pad2(params["wfc2"], Hp, Op)
    bfc = _pad2(params["bfc"], 1, Op)

    t_chunk = _pick_chunk(S, max_chunk)
    n_chunks = S // t_chunk

    out = pl.pallas_call(
        rnn_kernel,
        out_shape=jax.ShapeDtypeStruct((Bp, Op), jnp.float32),
        grid_spec=pltpu.PrefetchScalarGridSpec(
            num_scalar_prefetch=0,
            grid=(n_chunks,),
            in_specs=[
                pl.BlockSpec((Bp, t_chunk, Ep), lambda c: (0, c, 0)),  # x chunk
                pl.BlockSpec((Ep, Hp), lambda c: (0, 0)),              # Wx0
                pl.BlockSpec((1, Hp), lambda c: (0, 0)),               # b0
                pl.BlockSpec((Hp, Hp), lambda c: (0, 0)),              # Wh0
                pl.BlockSpec((Hp, Hp), lambda c: (0, 0)),              # Wx1
                pl.BlockSpec((Hp, Hp), lambda c: (0, 0)),              # Wh1
                pl.BlockSpec((1, Hp), lambda c: (0, 0)),               # b1
                pl.BlockSpec((Hp, Op), lambda c: (0, 0)),              # Wfc top
                pl.BlockSpec((Hp, Op), lambda c: (0, 0)),              # Wfc bot
                pl.BlockSpec((1, Op), lambda c: (0, 0)),               # bfc
            ],
            out_specs=pl.BlockSpec((Bp, Op), lambda c: (0, 0)),
            scratch_shapes=[
                pltpu.VMEM((Bp, Hp), jnp.float32),   # h1 state
                pltpu.VMEM((Bp, Hp), jnp.float32),   # h2 state
            ],
        ),
        compiler_params=pltpu.CompilerParams(
            dimension_semantics=("arbitrary",)),
    )(x, wx0, b0, wh0, wx1, wh1, b1, wfc1, wfc2, bfc)

    return out[:B, :O]


def ref_forward(token_ids, params):
    """Pure-JAX reference matching the PyTorch forward semantics."""
    emb = params["embedding"][token_ids]
    x = jnp.transpose(emb, (1, 0, 2))
    S, B, _ = x.shape
    H = params["wh0"].shape[0]
    h1 = jnp.zeros((B, H), jnp.float32)
    h2 = jnp.zeros((B, H), jnp.float32)
    for t in range(S):
        h1 = jnp.tanh(x[t] @ params["wx0"] + h1 @ params["wh0"] + params["b0"])
        h2 = jnp.tanh(h1 @ params["wx1"] + h2 @ params["wh1"] + params["b1"])
    # h_n.permute(1,0,2).reshape(B, 2H) == concat([h1, h2], -1)
    return h1 @ params["wfc1"] + h2 @ params["wfc2"] + params["bfc"]


def init_params(key, vocab_size, embed_size, hidden_size, output_size):
    ks = jax.random.split(key, 10)
    s_rnn = 1.0 / jnp.sqrt(hidden_size)
    s_fc = 1.0 / jnp.sqrt(2 * hidden_size)
    return {
        # nn.Embedding(vocab, embed): N(0, 1)
        "embedding": jax.random.normal(ks[0], (vocab_size, embed_size), jnp.float32),
        # layer 0: W_ih (E,H) transposed, W_hh (H,H) transposed, bias = b_ih + b_hh
        "wx0": jax.random.uniform(ks[1], (embed_size, hidden_size), jnp.float32, -s_rnn, s_rnn),
        "wh0": jax.random.uniform(ks[2], (hidden_size, hidden_size), jnp.float32, -s_rnn, s_rnn),
        "b0":  jax.random.uniform(ks[3], (1, hidden_size), jnp.float32, -s_rnn, s_rnn),
        # layer 1
        "wx1": jax.random.uniform(ks[4], (hidden_size, hidden_size), jnp.float32, -s_rnn, s_rnn),
        "wh1": jax.random.uniform(ks[5], (hidden_size, hidden_size), jnp.float32, -s_rnn, s_rnn),
        "b1":  jax.random.uniform(ks[6], (1, hidden_size), jnp.float32, -s_rnn, s_rnn),
        # fc: Linear(2H, O), weight transposed and split into the h1 / h2 halves
        "wfc1": jax.random.uniform(ks[7], (hidden_size, output_size), jnp.float32, -s_fc, s_fc),
        "wfc2": jax.random.uniform(ks[8], (hidden_size, output_size), jnp.float32, -s_fc, s_fc),
        "bfc":  jax.random.uniform(ks[9], (1, output_size), jnp.float32, -s_fc, s_fc),
    }


if __name__ == "__main__":
    # Small shapes consistent with the module: n_layers=2 (h_0 hardcodes 2).
    batch, seq = 2, 8
    vocab_size, embed_size, hidden_size, output_size = 50, 32, 32, 10

    key = jax.random.PRNGKey(0)
    k_tok, k_par = jax.random.split(key)
    params = init_params(k_par, vocab_size, embed_size, hidden_size, output_size)
    token_ids = jax.random.randint(k_tok, (batch, seq), 0, vocab_size, jnp.int32)

    fwd = jax.jit(lambda tok: vanilla_rnn_forward(tok, params))
    logits = jax.block_until_ready(fwd(token_ids))

    ref = ref_forward(token_ids, params)
    assert logits.shape == (batch, output_size)
    assert jnp.allclose(logits, ref, atol=1e-4, rtol=1e-4), (logits, ref)

    print("KERNEL_OK")
</pallas_src>

<mosaic_0001>
module attributes {stable_mosaic.version = 11 : i64} {
  func.func @rnn_kernel(%arg0: i32, %arg1: memref<8x8x128xf32, #tpu.memory_space<vmem>>, %arg2: memref<128x128xf32, #tpu.memory_space<vmem>>, %arg3: memref<1x128xf32, #tpu.memory_space<vmem>>, %arg4: memref<128x128xf32, #tpu.memory_space<vmem>>, %arg5: memref<128x128xf32, #tpu.memory_space<vmem>>, %arg6: memref<128x128xf32, #tpu.memory_space<vmem>>, %arg7: memref<1x128xf32, #tpu.memory_space<vmem>>, %arg8: memref<128x128xf32, #tpu.memory_space<vmem>>, %arg9: memref<128x128xf32, #tpu.memory_space<vmem>>, %arg10: memref<1x128xf32, #tpu.memory_space<vmem>>, %arg11: memref<8x128xf32, #tpu.memory_space<vmem>>, %arg12: memref<8x128xf32, #tpu.memory_space<vmem>>, %arg13: memref<8x128xf32, #tpu.memory_space<vmem>>) attributes {dimension_semantics = [#tpu.dimension_semantics<arbitrary>], iteration_bounds = array<i64: 1>, scalar_prefetch = 0 : i64, scratch_operands = 2 : i64, tpu.core_type = #tpu.core_type<tc>, window_params = [{transform_indices = @transform_0, window_bounds = array<i64: 8, 8, 128>}, {pipeline_mode = #tpu.pipeline_mode<synchronous>, transform_indices = @transform_1, window_bounds = array<i64: 128, 128>}, {pipeline_mode = #tpu.pipeline_mode<synchronous>, transform_indices = @transform_2, window_bounds = array<i64: 1, 128>}, {pipeline_mode = #tpu.pipeline_mode<synchronous>, transform_indices = @transform_3, window_bounds = array<i64: 128, 128>}, {pipeline_mode = #tpu.pipeline_mode<synchronous>, transform_indices = @transform_4, window_bounds = array<i64: 128, 128>}, {pipeline_mode = #tpu.pipeline_mode<synchronous>, transform_indices = @transform_5, window_bounds = array<i64: 128, 128>}, {pipeline_mode = #tpu.pipeline_mode<synchronous>, transform_indices = @transform_6, window_bounds = array<i64: 1, 128>}, {pipeline_mode = #tpu.pipeline_mode<synchronous>, transform_indices = @transform_7, window_bounds = array<i64: 128, 128>}, {pipeline_mode = #tpu.pipeline_mode<synchronous>, transform_indices = @transform_8, window_bounds = array<i64: 128, 128>}, {pipeline_mode = #tpu.pipeline_mode<synchronous>, transform_indices = @transform_9, window_bounds = array<i64: 1, 128>}, {pipeline_mode = #tpu.pipeline_mode<synchronous>, transform_indices = @transform_10, window_bounds = array<i64: 8, 128>}]} {
    %c0_i32 = arith.constant 0 : i32
    %0 = arith.cmpi eq, %arg0, %c0_i32 : i32
    %1 = arith.extui %0 : i1 to i32
    %c0_i32_0 = arith.constant 0 : i32
    %2 = arith.cmpi ne, %1, %c0_i32_0 : i32
    scf.if %2 {
      %cst_49 = arith.constant 0.000000e+00 : f32
      %110 = vector.broadcast %cst_49 : f32 to vector<8x128xf32>
      %c0_50 = arith.constant 0 : index
      %c0_51 = arith.constant 0 : index
      %111 = vector.load %arg12[%c0_50, %c0_51] : memref<8x128xf32, #tpu.memory_space<vmem>>, vector<8x128xf32>
      tpu.vector_store %arg12[%c0_50, %c0_51], %110 {strides = array<i32>} : memref<8x128xf32, #tpu.memory_space<vmem>>, vector<8x128xf32>,
      %cst_52 = arith.constant 0.000000e+00 : f32
      %112 = vector.broadcast %cst_52 : f32 to vector<8x128xf32>
      %c0_53 = arith.constant 0 : index
      %c0_54 = arith.constant 0 : index
      %113 = vector.load %arg13[%c0_53, %c0_54] : memref<8x128xf32, #tpu.memory_space<vmem>>, vector<8x128xf32>
      tpu.vector_store %arg13[%c0_53, %c0_54], %112 {strides = array<i32>} : memref<8x128xf32, #tpu.memory_space<vmem>>, vector<8x128xf32>,
    } else {
    }
    %c0 = arith.constant 0 : index
    %c0_1 = arith.constant 0 : index
    %c0_2 = arith.constant 0 : index
    %3 = vector.load %arg1[%c0, %c0_1, %c0_2] : memref<8x8x128xf32, #tpu.memory_space<vmem>>, vector<8x8x128xf32>
    %4 = vector.shape_cast %3 : vector<8x8x128xf32> to vector<64x128xf32>
    %c0_3 = arith.constant 0 : index
    %c0_4 = arith.constant 0 : index
    %5 = vector.load %arg2[%c0_3, %c0_4] : memref<128x128xf32, #tpu.memory_space<vmem>>, vector<128x128xf32>
    %cst = arith.constant dense<0.000000e+00> : vector<64x128xf32>
    %6 = tpu.matmul %4, %5, %cst {dimension_numbers = #tpu.dot_dimension_numbers<[1], [0], [0], [1], [0, 0, 1, 1], [], []>} : vector<64x128xf32>, vector<128x128xf32>, vector<64x128xf32> -> vector<64x128xf32>
    %c0_5 = arith.constant 0 : index
    %c0_6 = arith.constant 0 : index
    %7 = vector.load %arg3[%c0_5, %c0_6] : memref<1x128xf32, #tpu.memory_space<vmem>>, vector<1x128xf32>
    %8 = vector.broadcast %7 : vector<1x128xf32> to vector<64x128xf32>
    %9 = arith.addf %6, %8 : vector<64x128xf32>
    %10 = vector.shape_cast %9 : vector<64x128xf32> to vector<8x8x128xf32>
    %c0_7 = arith.constant 0 : index
    %c0_8 = arith.constant 0 : index
    %11 = vector.load %arg4[%c0_7, %c0_8] : memref<128x128xf32, #tpu.memory_space<vmem>>, vector<128x128xf32>
    %c0_9 = arith.constant 0 : index
    %c0_10 = arith.constant 0 : index
    %12 = vector.load %arg5[%c0_9, %c0_10] : memref<128x128xf32, #tpu.memory_space<vmem>>, vector<128x128xf32>
    %c0_11 = arith.constant 0 : index
    %c0_12 = arith.constant 0 : index
    %13 = vector.load %arg6[%c0_11, %c0_12] : memref<128x128xf32, #tpu.memory_space<vmem>>, vector<128x128xf32>
    %c0_13 = arith.constant 0 : index
    %c0_14 = arith.constant 0 : index
    %14 = vector.load %arg7[%c0_13, %c0_14] : memref<1x128xf32, #tpu.memory_space<vmem>>, vector<1x128xf32>
    %c0_15 = arith.constant 0 : index
    %c0_16 = arith.constant 0 : index
    %15 = vector.load %arg12[%c0_15, %c0_16] : memref<8x128xf32, #tpu.memory_space<vmem>>, vector<8x128xf32>
    %c0_17 = arith.constant 0 : index
    %c0_18 = arith.constant 0 : index
    %16 = vector.load %arg13[%c0_17, %c0_18] : memref<8x128xf32, #tpu.memory_space<vmem>>, vector<8x128xf32>
    %17 = vector.extract_strided_slice %10 {offsets = [0, 0, 0], sizes = [8, 1, 128], strides = [1, 1, 1]} : vector<8x8x128xf32> to vector<8x1x128xf32>
    %18 = vector.shape_cast %17 : vector<8x1x128xf32> to vector<8x128xf32>
    %cst_19 = arith.constant dense<0.000000e+00> : vector<8x128xf32>
    %19 = tpu.matmul %15, %11, %cst_19 {dimension_numbers = #tpu.dot_dimension_numbers<[1], [0], [0], [1], [0, 0, 1, 1], [], []>} : vector<8x128xf32>, vector<128x128xf32>, vector<8x128xf32> -> vector<8x128xf32>
    %20 = arith.addf %18, %19 : vector<8x128xf32>
    %21 = math.tanh %20 : vector<8x128xf32>
    %cst_20 = arith.constant dense<0.000000e+00> : vector<8x128xf32>
    %22 = tpu.matmul %21, %12, %cst_20 {dimension_numbers = #tpu.dot_dimension_numbers<[1], [0], [0], [1], [0, 0, 1, 1], [], []>} : vector<8x128xf32>, vector<128x128xf32>, vector<8x128xf32> -> vector<8x128xf32>
    %cst_21 = arith.constant dense<0.000000e+00> : vector<8x128xf32>
    %23 = tpu.matmul %16, %13, %cst_21 {dimension_numbers = #tpu.dot_dimension_numbers<[1], [0], [0], [1], [0, 0, 1, 1], [], []>} : vector<8x128xf32>, vector<128x128xf32>, vector<8x128xf32> -> vector<8x128xf32>
    %24 = arith.addf %22, %23 : vector<8x128xf32>
    %25 = vector.broadcast %14 : vector<1x128xf32> to vector<8x128xf32>
    %26 = arith.addf %24, %25 : vector<8x128xf32>
    %27 = math.tanh %26 : vector<8x128xf32>
    %28 = vector.extract_strided_slice %10 {offsets = [0, 1, 0], sizes = [8, 1, 128], strides = [1, 1, 1]} : vector<8x8x128xf32> to vector<8x1x128xf32>
    %29 = vector.shape_cast %28 : vector<8x1x128xf32> to vector<8x128xf32>
    %cst_22 = arith.constant dense<0.000000e+00> : vector<8x128xf32>
    %30 = tpu.matmul %21, %11, %cst_22 {dimension_numbers = #tpu.dot_dimension_numbers<[1], [0], [0], [1], [0, 0, 1, 1], [], []>} : vector<8x128xf32>, vector<128x128xf32>, vector<8x128xf32> -> vector<8x128xf32>
    %31 = arith.addf %29, %30 : vector<8x128xf32>
    %32 = math.tanh %31 : vector<8x128xf32>
    %cst_23 = arith.constant dense<0.000000e+00> : vector<8x128xf32>
    %33 = tpu.matmul %32, %12, %cst_23 {dimension_numbers = #tpu.dot_dimension_numbers<[1], [0], [0], [1], [0, 0, 1, 1], [], []>} : vector<8x128xf32>, vector<128x128xf32>, vector<8x128xf32> -> vector<8x128xf32>
    %cst_24 = arith.constant dense<0.000000e+00> : vector<8x128xf32>
    %34 = tpu.matmul %27, %13, %cst_24 {dimension_numbers = #tpu.dot_dimension_numbers<[1], [0], [0], [1], [0, 0, 1, 1], [], []>} : vector<8x128xf32>, vector<128x128xf32>, vector<8x128xf32> -> vector<8x128xf32>
    %35 = arith.addf %33, %34 : vector<8x128xf32>
    %36 = vector.broadcast %14 : vector<1x128xf32> to vector<8x128xf32>
    %37 = arith.addf %35, %36 : vector<8x128xf32>
    %38 = math.tanh %37 : vector<8x128xf32>
    %39 = vector.extract_strided_slice %10 {offsets = [0, 2, 0], sizes = [8, 1, 128], strides = [1, 1, 1]} : vector<8x8x128xf32> to vector<8x1x128xf32>
    %40 = vector.shape_cast %39 : vector<8x1x128xf32> to vector<8x128xf32>
    %cst_25 = arith.constant dense<0.000000e+00> : vector<8x128xf32>
    %41 = tpu.matmul %32, %11, %cst_25 {dimension_numbers = #tpu.dot_dimension_numbers<[1], [0], [0], [1], [0, 0, 1, 1], [], []>} : vector<8x128xf32>, vector<128x128xf32>, vector<8x128xf32> -> vector<8x128xf32>
    %42 = arith.addf %40, %41 : vector<8x128xf32>
    %43 = math.tanh %42 : vector<8x128xf32>
    %cst_26 = arith.constant dense<0.000000e+00> : vector<8x128xf32>
    %44 = tpu.matmul %43, %12, %cst_26 {dimension_numbers = #tpu.dot_dimension_numbers<[1], [0], [0], [1], [0, 0, 1, 1], [], []>} : vector<8x128xf32>, vector<128x128xf32>, vector<8x128xf32> -> vector<8x128xf32>
    %cst_27 = arith.constant dense<0.000000e+00> : vector<8x128xf32>
    %45 = tpu.matmul %38, %13, %cst_27 {dimension_numbers = #tpu.dot_dimension_numbers<[1], [0], [0], [1], [0, 0, 1, 1], [], []>} : vector<8x128xf32>, vector<128x128xf32>, vector<8x128xf32> -> vector<8x128xf32>
    %46 = arith.addf %44, %45 : vector<8x128xf32>
    %47 = vector.broadcast %14 : vector<1x128xf32> to vector<8x128xf32>
    %48 = arith.addf %46, %47 : vector<8x128xf32>
    %49 = math.tanh %48 : vector<8x128xf32>
    %50 = vector.extract_strided_slice %10 {offsets = [0, 3, 0], sizes = [8, 1, 128], strides = [1, 1, 1]} : vector<8x8x128xf32> to vector<8x1x128xf32>
    %51 = vector.shape_cast %50 : vector<8x1x128xf32> to vector<8x128xf32>
    %cst_28 = arith.constant dense<0.000000e+00> : vector<8x128xf32>
    %52 = tpu.matmul %43, %11, %cst_28 {dimension_numbers = #tpu.dot_dimension_numbers<[1], [0], [0], [1], [0, 0, 1, 1], [], []>} : vector<8x128xf32>, vector<128x128xf32>, vector<8x128xf32> -> vector<8x128xf32>
    %53 = arith.addf %51, %52 : vector<8x128xf32>
    %54 = math.tanh %53 : vector<8x128xf32>
    %cst_29 = arith.constant dense<0.000000e+00> : vector<8x128xf32>
    %55 = tpu.matmul %54, %12, %cst_29 {dimension_numbers = #tpu.dot_dimension_numbers<[1], [0], [0], [1], [0, 0, 1, 1], [], []>} : vector<8x128xf32>, vector<128x128xf32>, vector<8x128xf32> -> vector<8x128xf32>
    %cst_30 = arith.constant dense<0.000000e+00> : vector<8x128xf32>
    %56 = tpu.matmul %49, %13, %cst_30 {dimension_numbers = #tpu.dot_dimension_numbers<[1], [0], [0], [1], [0, 0, 1, 1], [], []>} : vector<8x128xf32>, vector<128x128xf32>, vector<8x128xf32> -> vector<8x128xf32>
    %57 = arith.addf %55, %56 : vector<8x128xf32>
    %58 = vector.broadcast %14 : vector<1x128xf32> to vector<8x128xf32>
    %59 = arith.addf %57, %58 : vector<8x128xf32>
    %60 = math.tanh %59 : vector<8x128xf32>
    %61 = vector.extract_strided_slice %10 {offsets = [0, 4, 0], sizes = [8, 1, 128], strides = [1, 1, 1]} : vector<8x8x128xf32> to vector<8x1x128xf32>
    %62 = vector.shape_cast %61 : vector<8x1x128xf32> to vector<8x128xf32>
    %cst_31 = arith.constant dense<0.000000e+00> : vector<8x128xf32>
    %63 = tpu.matmul %54, %11, %cst_31 {dimension_numbers = #tpu.dot_dimension_numbers<[1], [0], [0], [1], [0, 0, 1, 1], [], []>} : vector<8x128xf32>, vector<128x128xf32>, vector<8x128xf32> -> vector<8x128xf32>
    %64 = arith.addf %62, %63 : vector<8x128xf32>
    %65 = math.tanh %64 : vector<8x128xf32>
    %cst_32 = arith.constant dense<0.000000e+00> : vector<8x128xf32>
    %66 = tpu.matmul %65, %12, %cst_32 {dimension_numbers = #tpu.dot_dimension_numbers<[1], [0], [0], [1], [0, 0, 1, 1], [], []>} : vector<8x128xf32>, vector<128x128xf32>, vector<8x128xf32> -> vector<8x128xf32>
    %cst_33 = arith.constant dense<0.000000e+00> : vector<8x128xf32>
    %67 = tpu.matmul %60, %13, %cst_33 {dimension_numbers = #tpu.dot_dimension_numbers<[1], [0], [0], [1], [0, 0, 1, 1], [], []>} : vector<8x128xf32>, vector<128x128xf32>, vector<8x128xf32> -> vector<8x128xf32>
    %68 = arith.addf %66, %67 : vector<8x128xf32>
    %69 = vector.broadcast %14 : vector<1x128xf32> to vector<8x128xf32>
    %70 = arith.addf %68, %69 : vector<8x128xf32>
    %71 = math.tanh %70 : vector<8x128xf32>
    %72 = vector.extract_strided_slice %10 {offsets = [0, 5, 0], sizes = [8, 1, 128], strides = [1, 1, 1]} : vector<8x8x128xf32> to vector<8x1x128xf32>
    %73 = vector.shape_cast %72 : vector<8x1x128xf32> to vector<8x128xf32>
    %cst_34 = arith.constant dense<0.000000e+00> : vector<8x128xf32>
    %74 = tpu.matmul %65, %11, %cst_34 {dimension_numbers = #tpu.dot_dimension_numbers<[1], [0], [0], [1], [0, 0, 1, 1], [], []>} : vector<8x128xf32>, vector<128x128xf32>, vector<8x128xf32> -> vector<8x128xf32>
    %75 = arith.addf %73, %74 : vector<8x128xf32>
    %76 = math.tanh %75 : vector<8x128xf32>
    %cst_35 = arith.constant dense<0.000000e+00> : vector<8x128xf32>
    %77 = tpu.matmul %76, %12, %cst_35 {dimension_numbers = #tpu.dot_dimension_numbers<[1], [0], [0], [1], [0, 0, 1, 1], [], []>} : vector<8x128xf32>, vector<128x128xf32>, vector<8x128xf32> -> vector<8x128xf32>
    %cst_36 = arith.constant dense<0.000000e+00> : vector<8x128xf32>
    %78 = tpu.matmul %71, %13, %cst_36 {dimension_numbers = #tpu.dot_dimension_numbers<[1], [0], [0], [1], [0, 0, 1, 1], [], []>} : vector<8x128xf32>, vector<128x128xf32>, vector<8x128xf32> -> vector<8x128xf32>
    %79 = arith.addf %77, %78 : vector<8x128xf32>
    %80 = vector.broadcast %14 : vector<1x128xf32> to vector<8x128xf32>
    %81 = arith.addf %79, %80 : vector<8x128xf32>
    %82 = math.tanh %81 : vector<8x128xf32>
    %83 = vector.extract_strided_slice %10 {offsets = [0, 6, 0], sizes = [8, 1, 128], strides = [1, 1, 1]} : vector<8x8x128xf32> to vector<8x1x128xf32>
    %84 = vector.shape_cast %83 : vector<8x1x128xf32> to vector<8x128xf32>
    %cst_37 = arith.constant dense<0.000000e+00> : vector<8x128xf32>
    %85 = tpu.matmul %76, %11, %cst_37 {dimension_numbers = #tpu.dot_dimension_numbers<[1], [0], [0], [1], [0, 0, 1, 1], [], []>} : vector<8x128xf32>, vector<128x128xf32>, vector<8x128xf32> -> vector<8x128xf32>
    %86 = arith.addf %84, %85 : vector<8x128xf32>
    %87 = math.tanh %86 : vector<8x128xf32>
    %cst_38 = arith.constant dense<0.000000e+00> : vector<8x128xf32>
    %88 = tpu.matmul %87, %12, %cst_38 {dimension_numbers = #tpu.dot_dimension_numbers<[1], [0], [0], [1], [0, 0, 1, 1], [], []>} : vector<8x128xf32>, vector<128x128xf32>, vector<8x128xf32> -> vector<8x128xf32>
    %cst_39 = arith.constant dense<0.000000e+00> : vector<8x128xf32>
    %89 = tpu.matmul %82, %13, %cst_39 {dimension_numbers = #tpu.dot_dimension_numbers<[1], [0], [0], [1], [0, 0, 1, 1], [], []>} : vector<8x128xf32>, vector<128x128xf32>, vector<8x128xf32> -> vector<8x128xf32>
    %90 = arith.addf %88, %89 : vector<8x128xf32>
    %91 = vector.broadcast %14 : vector<1x128xf32> to vector<8x128xf32>
    %92 = arith.addf %90, %91 : vector<8x128xf32>
    %93 = math.tanh %92 : vector<8x128xf32>
    %94 = vector.extract_strided_slice %10 {offsets = [0, 7, 0], sizes = [8, 1, 128], strides = [1, 1, 1]} : vector<8x8x128xf32> to vector<8x1x128xf32>
    %95 = vector.shape_cast %94 : vector<8x1x128xf32> to vector<8x128xf32>
    %cst_40 = arith.constant dense<0.000000e+00> : vector<8x128xf32>
    %96 = tpu.matmul %87, %11, %cst_40 {dimension_numbers = #tpu.dot_dimension_numbers<[1], [0], [0], [1], [0, 0, 1, 1], [], []>} : vector<8x128xf32>, vector<128x128xf32>, vector<8x128xf32> -> vector<8x128xf32>
    %97 = arith.addf %95, %96 : vector<8x128xf32>
    %98 = math.tanh %97 : vector<8x128xf32>
    %cst_41 = arith.constant dense<0.000000e+00> : vector<8x128xf32>
    %99 = tpu.matmul %98, %12, %cst_41 {dimension_numbers = #tpu.dot_dimension_numbers<[1], [0], [0], [1], [0, 0, 1, 1], [], []>} : vector<8x128xf32>, vector<128x128xf32>, vector<8x128xf32> -> vector<8x128xf32>
    %cst_42 = arith.constant dense<0.000000e+00> : vector<8x128xf32>
    %100 = tpu.matmul %93, %13, %cst_42 {dimension_numbers = #tpu.dot_dimension_numbers<[1], [0], [0], [1], [0, 0, 1, 1], [], []>} : vector<8x128xf32>, vector<128x128xf32>, vector<8x128xf32> -> vector<8x128xf32>
    %101 = arith.addf %99, %100 : vector<8x128xf32>
    %102 = vector.broadcast %14 : vector<1x128xf32> to vector<8x128xf32>
    %103 = arith.addf %101, %102 : vector<8x128xf32>
    %104 = math.tanh %103 : vector<8x128xf32>
    %c0_43 = arith.constant 0 : index
    %c0_44 = arith.constant 0 : index
    %105 = vector.load %arg12[%c0_43, %c0_44] : memref<8x128xf32, #tpu.memory_space<vmem>>, vector<8x128xf32>
    tpu.vector_store %arg12[%c0_43, %c0_44], %98 {strides = array<i32>} : memref<8x128xf32, #tpu.memory_space<vmem>>, vector<8x128xf32>,
    %c0_45 = arith.constant 0 : index
    %c0_46 = arith.constant 0 : index
    %106 = vector.load %arg13[%c0_45, %c0_46] : memref<8x128xf32, #tpu.memory_space<vmem>>, vector<8x128xf32>
    tpu.vector_store %arg13[%c0_45, %c0_46], %104 {strides = array<i32>} : memref<8x128xf32, #tpu.memory_space<vmem>>, vector<8x128xf32>,
    %c0_i32_47 = arith.constant 0 : i32
    %107 = arith.cmpi eq, %arg0, %c0_i32_47 : i32
    %108 = arith.extui %107 : i1 to i32
    %c0_i32_48 = arith.constant 0 : i32
    %109 = arith.cmpi ne, %108, %c0_i32_48 : i32
    scf.if %109 {
      %c0_49 = arith.constant 0 : index
      %c0_50 = arith.constant 0 : index
      %110 = vector.load %arg8[%c0_49, %c0_50] : memref<128x128xf32, #tpu.memory_space<vmem>>, vector<128x128xf32>
      %cst_51 = arith.constant dense<0.000000e+00> : vector<8x128xf32>
      %111 = tpu.matmul %98, %110, %cst_51 {dimension_numbers = #tpu.dot_dimension_numbers<[1], [0], [0], [1], [0, 0, 1, 1], [], []>} : vector<8x128xf32>, vector<128x128xf32>, vector<8x128xf32> -> vector<8x128xf32>
      %c0_52 = arith.constant 0 : index
      %c0_53 = arith.constant 0 : index
      %112 = vector.load %arg9[%c0_52, %c0_53] : memref<128x128xf32, #tpu.memory_space<vmem>>, vector<128x128xf32>
      %cst_54 = arith.constant dense<0.000000e+00> : vector<8x128xf32>
      %113 = tpu.matmul %104, %112, %cst_54 {dimension_numbers = #tpu.dot_dimension_numbers<[1], [0], [0], [1], [0, 0, 1, 1], [], []>} : vector<8x128xf32>, vector<128x128xf32>, vector<8x128xf32> -> vector<8x128xf32>
      %114 = arith.addf %111, %113 : vector<8x128xf32>
      %c0_55 = arith.constant 0 : index
      %c0_56 = arith.constant 0 : index
      %115 = vector.load %arg10[%c0_55, %c0_56] : memref<1x128xf32, #tpu.memory_space<vmem>>, vector<1x128xf32>
      %116 = vector.broadcast %115 : vector<1x128xf32> to vector<8x128xf32>
      %117 = arith.addf %114, %116 : vector<8x128xf32>
      %c0_57 = arith.constant 0 : index
      %c0_58 = arith.constant 0 : index
      %118 = vector.load %arg11[%c0_57, %c0_58] : memref<8x128xf32, #tpu.memory_space<vmem>>, vector<8x128xf32>
      tpu.vector_store %arg11[%c0_57, %c0_58], %117 {strides = array<i32>} : memref<8x128xf32, #tpu.memory_space<vmem>>, vector<8x128xf32>,
    } else {
    }
    return
  }
  func.func @transform_0(%arg0: i32) -> (i32, i32, i32) {
    %c0_i32 = arith.constant 0 : i32
    %c0_i32_0 = arith.constant 0 : i32
    %c0_i32_1 = arith.constant 0 : i32
    return %c0_i32, %arg0, %c0_i32_0 : i32, i32, i32
  }
  func.func @transform_1(%arg0: i32) -> (i32, i32) {
    %c0_i32 = arith.constant 0 : i32
    %c0_i32_0 = arith.constant 0 : i32
    %c0_i32_1 = arith.constant 0 : i32
    return %c0_i32, %c0_i32_0 : i32, i32
  }
  func.func @transform_2(%arg0: i32) -> (i32, i32) {
    %c0_i32 = arith.constant 0 : i32
    %c0_i32_0 = arith.constant 0 : i32
    %c0_i32_1 = arith.constant 0 : i32
    return %c0_i32, %c0_i32_0 : i32, i32
  }
  func.func @transform_3(%arg0: i32) -> (i32, i32) {
    %c0_i32 = arith.constant 0 : i32
    %c0_i32_0 = arith.constant 0 : i32
    %c0_i32_1 = arith.constant 0 : i32
    return %c0_i32, %c0_i32_0 : i32, i32
  }
  func.func @transform_4(%arg0: i32) -> (i32, i32) {
    %c0_i32 = arith.constant 0 : i32
    %c0_i32_0 = arith.constant 0 : i32
    %c0_i32_1 = arith.constant 0 : i32
    return %c0_i32, %c0_i32_0 : i32, i32
  }
  func.func @transform_5(%arg0: i32) -> (i32, i32) {
    %c0_i32 = arith.constant 0 : i32
    %c0_i32_0 = arith.constant 0 : i32
    %c0_i32_1 = arith.constant 0 : i32
    return %c0_i32, %c0_i32_0 : i32, i32
  }
  func.func @transform_6(%arg0: i32) -> (i32, i32) {
    %c0_i32 = arith.constant 0 : i32
    %c0_i32_0 = arith.constant 0 : i32
    %c0_i32_1 = arith.constant 0 : i32
    return %c0_i32, %c0_i32_0 : i32, i32
  }
  func.func @transform_7(%arg0: i32) -> (i32, i32) {
    %c0_i32 = arith.constant 0 : i32
    %c0_i32_0 = arith.constant 0 : i32
    %c0_i32_1 = arith.constant 0 : i32
    return %c0_i32, %c0_i32_0 : i32, i32
  }
  func.func @transform_8(%arg0: i32) -> (i32, i32) {
    %c0_i32 = arith.constant 0 : i32
    %c0_i32_0 = arith.constant 0 : i32
    %c0_i32_1 = arith.constant 0 : i32
    return %c0_i32, %c0_i32_0 : i32, i32
  }
  func.func @transform_9(%arg0: i32) -> (i32, i32) {
    %c0_i32 = arith.constant 0 : i32
    %c0_i32_0 = arith.constant 0 : i32
    %c0_i32_1 = arith.constant 0 : i32
    return %c0_i32, %c0_i32_0 : i32, i32
  }
  func.func @transform_10(%arg0: i32) -> (i32, i32) {
    %c0_i32 = arith.constant 0 : i32
    %c0_i32_0 = arith.constant 0 : i32
    %c0_i32_1 = arith.constant 0 : i32
    return %c0_i32, %c0_i32_0 : i32, i32
  }
}

</mosaic_0001>

<bundles_post_ra>
// kernel: _lambda_.1
= control target key start
LH: loop header
LB: loop body
LE: loop exit
PB: predicated region body
PF: predicated region fallthrough
CT: control target
= control target key end

     0   :  { %15 = vsyncpa [#allocation5], 0  ;;  %s5847_s0 = inlined_call_operand.vmem [shape: f32[8,8,128], index: 0, kind: input, shape index: {}]   ;;  %s5848_s1 = inlined_call_operand.hbm [shape: f32[128,128], index: 1, kind: input, shape index: {}]   ;;  %s5849_s2 = inlined_call_operand.hbm [shape: f32[1,128], index: 2, kind: input, shape index: {}]   ;;  %s5850_s3 = inlined_call_operand.hbm [shape: f32[128,128], index: 3, kind: input, shape index: {}]   ;;  %s5851_s4 = inlined_call_operand.hbm [shape: f32[128,128], index: 4, kind: input, shape index: {}]   ;;  %s5852_s5 = inlined_call_operand.hbm [shape: f32[128,128], index: 5, kind: input, shape index: {}]   ;;  %s5853_s6 = inlined_call_operand.hbm [shape: f32[1,128], index: 6, kind: input, shape index: {}]   ;;  %s5854_s7 = inlined_call_operand.vmem [shape: f32[128,128], index: 7, kind: input, shape index: {}]   ;;  %s5855_s8 = inlined_call_operand.vmem [shape: f32[128,128], index: 8, kind: input, shape index: {}]   ;;  %s5856_s9 = inlined_call_operand.vmem [shape: f32[1,128], index: 9, kind: input, shape index: {}]   ;;  %s5857_s10 = inlined_call_operand.vmem [shape: f32[8,128], index: 10, kind: output, shape index: {}]  }
   0x1   :  { %16 = vsyncpa [#allocation7], 0 }
   0x2   :  { %17 = vsyncpa [#allocation10], 0 }
   0x3   :  { %18 = vsyncpa [#allocation13], 0  ;;  %s4453_s13 = smov [#allocation6]  }
   0x4   :  { %s39_s14 = sshll.u32 %s4453_s13, 4  ;;  %s40_s14 = int_to_ptr.vmem [resolvable:$true] %s39_s14 }
   0x5   :  { %s4333_s15 = scalar_lea.vmem %s40_s14, 16  ;;  %s4337_s16 = scalar_lea.vmem %s40_s14, 32 }
   0x6   :  { %p4334_p0 = scmp.ne.s32.totalorder %s40_s14, %s4333_s15  ;;  %p4338_p1 = scmp.lt.s32.totalorder %s40_s14, %s40_s14 }
   0x7   :  { %p4339_p2 = scmp.lt.s32.totalorder %s4337_s16, %s4333_s15 }
   0x9   :  { %p4340_p3 = por %p4339_p2, %p4338_p1 }
   0xb   :  { %p4341_p4 = pnand %p4340_p3, %p4334_p0 }
   0xd   :  { %4344 = shalt.err (!%p4341_p4)
}
   0xe   :  { %42 = dma.hbm_to_vmem [thread:$0]  %s5849_s2, 16, %s40_s14, [#allocation7]  }
   0xf   :  { %s4454_s19 = smov [#allocation9]   ;;  %s4455_s21 = smov [#allocation4]  }
  0x10   :  { %s60_s20 = sshll.u32 %s4454_s19, 4  ;;  %s26_s22 = sshll.u32 %s4455_s21, 4  ;;  %s61_s20 = int_to_ptr.vmem [resolvable:$true] %s60_s20  ;;  %s27_s22 = int_to_ptr.vmem [resolvable:$true] %s26_s22 }
  0x11   :  { %s4353_s23 = scalar_lea.vmem %s61_s20, 2048  ;;  %p4358_p6 = scmp.lt.s32.totalorder %s61_s20, %s61_s20 }
  0x12   :  { %p4354_p5 = scmp.ne.s32.totalorder %s61_s20, %s4353_s23  ;;  %p4359_p7 = scmp.lt.s32.totalorder %s4353_s23, %s4353_s23 }
  0x14   :  { %p4360_p8 = por %p4359_p7, %p4358_p6 }
  0x16   :  { %p4361_p9 = pnand %p4360_p8, %p4354_p5 }
  0x18   :  { %4364 = shalt.err (!%p4361_p9)
}
  0x19   :  { %s4456_s24 = smov 128   ;;  %s4457_s25 = smov 8  }
  0x1a   :  { %66 = dma.hbm_to_vmem [thread:$0]  %s5851_s4, 2048, %s61_s20, [#allocation10], %s4456_s24, %s4456_s24, %s4457_s25  }
  0x1b   :  { %s4373_s2 = scalar_lea.vmem %s27_s22, 2048  ;;  %p4378_p11 = scmp.lt.s32.totalorder %s27_s22, %s27_s22 }
  0x1c   :  { %p4374_p10 = scmp.ne.s32.totalorder %s27_s22, %s4373_s2  ;;  %p4379_p12 = scmp.lt.s32.totalorder %s4373_s2, %s4373_s2 }
  0x1e   :  { %p4380_p13 = por %p4379_p12, %p4378_p11 }
  0x20   :  { %p4381_p0 = pnand %p4380_p13, %p4374_p10 }
  0x22   :  { %4384 = shalt.err (!%p4381_p0)
}
  0x23   :  { %32 = dma.hbm_to_vmem [thread:$0]  %s5848_s1, 2048, %s27_s22, [#allocation5], %s4456_s24, %s4456_s24, %s4457_s25  }
  0x24   :  { %s4458_s30 = smov [#allocation8]   ;;  %s4459_s12 = smov [#allocation11]  }
  0x25   :  { %s48_s11 = sshll.u32 %s4458_s30, 4  ;;  %s72_s4 = sshll.u32 %s4459_s12, 4  ;;  %s49_s11 = int_to_ptr.vmem [resolvable:$true] %s48_s11  ;;  %s73_s4 = int_to_ptr.vmem [resolvable:$true] %s72_s4 }
  0x26   :  { %s4393_s13 = scalar_lea.vmem %s49_s11, 2048  ;;  %p4398_p2 = scmp.lt.s32.totalorder %s49_s11, %s49_s11 }
  0x27   :  { %p4394_p1 = scmp.ne.s32.totalorder %s49_s11, %s4393_s13  ;;  %p4399_p3 = scmp.lt.s32.totalorder %s4393_s13, %s4393_s13 }
  0x29   :  { %p4400_p4 = por %p4399_p3, %p4398_p2 }
  0x2b   :  { %p4401_p5 = pnand %p4400_p4, %p4394_p1 }
  0x2d   :  { %4404 = shalt.err (!%p4401_p5)
}
  0x2e   :  { %54 = dma.hbm_to_vmem [thread:$0]  %s5850_s3, 2048, %s49_s11, [#allocation7], %s4456_s24, %s4456_s24, %s4457_s25  }
  0x2f   :  { %s4413_s1 = scalar_lea.vmem %s73_s4, 2048  ;;  %p4418_p7 = scmp.lt.s32.totalorder %s73_s4, %s73_s4 }
  0x30   :  { %p4414_p6 = scmp.ne.s32.totalorder %s73_s4, %s4413_s1  ;;  %p4419_p8 = scmp.lt.s32.totalorder %s4413_s1, %s4413_s1 }
  0x32   :  { %p4420_p9 = por %p4419_p8, %p4418_p7 }
  0x34   :  { %p4421_p10 = pnand %p4420_p9, %p4414_p6 }
  0x36   :  { %4424 = shalt.err (!%p4421_p10)
}
  0x37   :  { %78 = dma.hbm_to_vmem [thread:$0]  %s5852_s5, 2048, %s73_s4, [#allocation10], %s4456_s24, %s4456_s24, %s4457_s25  }
  0x38   :  { %s4460_s18 = smov [#allocation12]  }
  0x39   :  { %s85_s19 = sshll.u32 %s4460_s18, 4  ;;  %s86_s19 = int_to_ptr.vmem [resolvable:$true] %s85_s19 }
  0x3a   :  { %s4433_s20 = scalar_lea.vmem %s86_s19, 16  ;;  %s4437_s3 = scalar_lea.vmem %s86_s19, 32 }
  0x3b   :  { %p4434_p11 = scmp.ne.s32.totalorder %s86_s19, %s4433_s20  ;;  %p4438_p12 = scmp.lt.s32.totalorder %s86_s19, %s86_s19 }
  0x3c   :  { %p4439_p13 = scmp.lt.s32.totalorder %s4437_s3, %s4433_s20 }
  0x3e   :  { %p4440_p0 = por %p4439_p13, %p4438_p12 }
  0x40   :  { %p4441_p1 = pnand %p4440_p0, %p4434_p11 }
  0x42   :  { %4444 = shalt.err (!%p4441_p1)
}
  0x43   :  { %88 = dma.hbm_to_vmem [thread:$0]  %s5853_s6, 16, %s86_s19, [#allocation13]  }
  0x44   :  { %4445 = dma.done.wait [#allocation5], 2048  }
  0x45   :  { %4446 = vsyncadd [#allocation5], 4294965248 }
  0x46   :  { %4447 = dma.done.wait [#allocation7], 2064  }
  0x47   :  { %4448 = vsyncadd [#allocation7], 4294965232 }
  0x48   :  { %4449 = dma.done.wait [#allocation10], 4096  }
  0x49   :  { %4450 = vsyncadd [#allocation10], 4294963200 }
  0x4a   :  { %4451 = dma.done.wait [#allocation13], 16  }
  0x4b   :  { %4452 = vsyncadd [#allocation13], 4294967280  ;;  %v5858_v0 = vmov 0.0   ;;  %vm4462_vm0 = vmmov 0   ;;  %v142_v1 = vld [vmem:[#allocation4 + $0x78] sm:$0xff]  ;;  %v141_v3 = vld [vmem:[#allocation4 + $0x70] sm:$0xff] }
  0x4c   :  { %3178 = vmatprep.subr.mxu1 %v5858_v0  ;;  %117 = vst [vmem:[#allocation2] sm:$0xff] %v5858_v0  ;;  %3210 = vmatprep.mubr.msk.f32.mxu1 %vm4462_vm0, %v5858_v0  ;;  %v4552_v2 = vld [vmem:[#allocation8 + $0x78] sm:$0xff]  ;;  %v4555_v4 = vld [vmem:[#allocation8 + $0x70] sm:$0xff]  ;;  %v140_v5 = vld [vmem:[#allocation4 + $0x68] sm:$0xff]  ;;  %vm487_vm1 = vcmask 1041409   ;;  %vm490_vm2 = vcmask 1042434  }
  0x4d   :  { %3134 = vmatprep.subr.mxu0 %v142_v1  ;;  %3179 = vmatpush3.msra.mxu1 %v4552_v2  ;;  %v4558_v6 = vld [vmem:[#allocation8 + $0x68] sm:$0xff]  ;;  %v139_v7 = vld [vmem:[#allocation4 + $0x60] sm:$0xff]  ;;  %v138_v9 = vld [vmem:[#allocation4 + $0x58] sm:$0xff]  ;;  %vm493_vm3 = vcmask 1043459   ;;  %vm496_vm4 = vcmask 1044484   ;;  %vm499_vm5 = vcmask 1045509  }
  0x4e   :  { %3135 = vmatpush3.msra.mxu0 %v142_v1  ;;  %3180 = vmatprep.subr.mxu1 %v5858_v0  ;;  %v4562_v8 = vld [vmem:[#allocation8 + $0x60] sm:$0xff]  ;;  %v4566_v10 = vld [vmem:[#allocation8 + $0x58] sm:$0xff]  ;;  %v137_v11 = vld [vmem:[#allocation4 + $0x50] sm:$0xff]  ;;  %vm502_vm6 = vcmask 1046534   ;;  %vm505_vm7 = vcmask 1047559  }
  0x4f   :  { %3136 = vmatprep.subr.mxu0 %v141_v3  ;;  %3181 = vmatpush3.msra.mxu1 %v4555_v4  ;;  %v4570_v12 = vld [vmem:[#allocation8 + $0x50] sm:$0xff]  ;;  %v136_v13 = vld [vmem:[#allocation4 + $0x48] sm:$0xff]  ;;  %v135_v15 = vld [vmem:[#allocation4 + $0x40] sm:$0xff] }
  0x50   :  { %3137 = vmatpush3.msra.mxu0 %v141_v3  ;;  %3182 = vmatprep.subr.mxu1 %v5858_v0  ;;  %v4574_v14 = vld [vmem:[#allocation8 + $0x48] sm:$0xff]  ;;  %v4578_v16 = vld [vmem:[#allocation8 + $0x40] sm:$0xff]  ;;  %v134_v17 = vld [vmem:[#allocation4 + $0x38] sm:$0xff] }
  0x51   :  { %3138 = vmatprep.subr.mxu0 %v140_v5  ;;  %3183 = vmatpush3.msra.mxu1 %v4558_v6  ;;  %v4582_v18 = vld [vmem:[#allocation8 + $0x38] sm:$0xff]  ;;  %v133_v19 = vld [vmem:[#allocation4 + $0x30] sm:$0xff]  ;;  %v132_v21 = vld [vmem:[#allocation4 + $0x28] sm:$0xff] }
  0x52   :  { %3139 = vmatpush3.msra.mxu0 %v140_v5  ;;  %3184 = vmatprep.subr.mxu1 %v5858_v0  ;;  %5895 = vst [vmem:[#allocation18_spill] sm:$0xff] %v4582_v18  ;;  %v4586_v20 = vld [vmem:[#allocation8 + $0x30] sm:$0xff]  ;;  %v4590_v22 = vld [vmem:[#allocation8 + $0x28] sm:$0xff]  ;;  %v131_v23 = vld [vmem:[#allocation4 + $0x20] sm:$0xff] }
  0x53   :  { %3140 = vmatprep.subr.mxu0 %v139_v7  ;;  %3185 = vmatpush3.msra.mxu1 %v4562_v8  ;;  %5896 = vst [vmem:[#allocation19_spill] sm:$0xff] %v4586_v20  ;;  %5897 = vst [vmem:[#allocation20_spill] sm:$0xff] %v4590_v22  ;;  %v4594_v24 = vld [vmem:[#allocation8 + $0x20] sm:$0xff]  ;;  %v130_v25 = vld [vmem:[#allocation4 + $0x18] sm:$0xff] }
  0x54   :  { %3141 = vmatpush3.msra.mxu0 %v139_v7  ;;  %3186 = vmatprep.subr.mxu1 %v5858_v0  ;;  %5898 = vst [vmem:[#allocation21_spill] sm:$0xff] %v4594_v24  ;;  %v4598_v26 = vld [vmem:[#allocation8 + $0x18] sm:$0xff]  ;;  %v129_v27 = vld [vmem:[#allocation4 + $0x10] sm:$0xff]  ;;  %v128_v29 = vld [vmem:[#allocation4 + $0x8] sm:$0xff] }
  0x55   :  { %3142 = vmatprep.subr.mxu0 %v138_v9  ;;  %3187 = vmatpush3.msra.mxu1 %v4566_v10  ;;  %5899 = vst [vmem:[#allocation22_spill] sm:$0xff] %v4598_v26  ;;  %v4602_v28 = vld [vmem:[#allocation8 + $0x10] sm:$0xff]  ;;  %v4606_v30 = vld [vmem:[#allocation8 + $0x8] sm:$0xff]  ;;  %v127_v31 = vld [vmem:[#allocation4] sm:$0xff] }
  0x56   :  { %3143 = vmatpush3.msra.mxu0 %v138_v9  ;;  %3188 = vmatprep.subr.mxu1 %v5858_v0  ;;  %5900 = vst [vmem:[#allocation23_spill] sm:$0xff] %v4602_v28  ;;  %5901 = vst [vmem:[#allocation24_spill] sm:$0xff] %v4606_v30  ;;  %v119_v32 = vld [vmem:[%s5847_s0] sm:$0xff]  ;;  %v4614_v33 = vld [vmem:[#allocation8] sm:$0xff] }
  0x57   :  { %3144 = vmatprep.subr.mxu0 %v137_v11  ;;  %3189 = vmatpush3.msra.mxu1 %v4570_v12  ;;  %5902 = vst [vmem:[#allocation25_spill] sm:$0xff] %v4614_v33  ;;  %v120_v34 = vld [vmem:[%s5847_s0 + $0x8] sm:$0xff]  ;;  %v121_v35 = vld [vmem:[%s5847_s0 + $0x10] sm:$0xff]  ;;  %v122_v37 = vld [vmem:[%s5847_s0 + $0x18] sm:$0xff] }
  0x58   :  { %3145 = vmatpush3.msra.mxu0 %v137_v11  ;;  %3190 = vmatprep.subr.mxu1 %v5858_v0  ;;  %v4624_v36 = vld [vmem:[#allocation11 + $0x78] sm:$0xff]  ;;  %v4635_v39 = vld [vmem:[#allocation11 + $0x70] sm:$0xff]  ;;  %v4641_v40 = vld [vmem:[#allocation11 + $0x68] sm:$0xff] }
  0x59   :  { %3146 = vmatprep.subr.mxu0 %v136_v13  ;;  %3191 = vmatpush3.msra.mxu1 %v4574_v14  ;;  %v123_v38 = vld [vmem:[%s5847_s0 + $0x20] sm:$0xff]  ;;  %v124_v41 = vld [vmem:[%s5847_s0 + $0x28] sm:$0xff]  ;;  %v125_v42 = vld [vmem:[%s5847_s0 + $0x30] sm:$0xff] }
  0x5a   :  { %3147 = vmatpush3.msra.mxu0 %v136_v13  ;;  %3192 = vmatprep.subr.mxu1 %v5858_v0  ;;  %v4651_v43 = vld [vmem:[#allocation11 + $0x60] sm:$0xff]  ;;  %v4655_v44 = vld [vmem:[#allocation11 + $0x58] sm:$0xff]  ;;  %v126_v45 = vld [vmem:[%s5847_s0 + $0x38] sm:$0xff] }
  0x5b   :  { %3148 = vmatprep.subr.mxu0 %v135_v15  ;;  %3193 = vmatpush3.msra.mxu1 %v4578_v16  ;;  %v4662_v46 = vld [vmem:[#allocation11 + $0x50] sm:$0xff]  ;;  %v4666_v47 = vld [vmem:[#allocation11 + $0x48] sm:$0xff]  ;;  %v4672_v48 = vld [vmem:[#allocation11 + $0x40] sm:$0xff] }
  0x5c   :  { %3149 = vmatpush3.msra.mxu0 %v135_v15  ;;  %3194 = vmatprep.subr.mxu1 %v5858_v0  ;;  %v4676_v49 = vld [vmem:[#allocation11 + $0x38] sm:$0xff]  ;;  %v4680_v50 = vld [vmem:[#allocation11 + $0x30] sm:$0xff]  ;;  %v4684_v51 = vld [vmem:[#allocation11 + $0x28] sm:$0xff] }
  0x5d   :  { %3150 = vmatprep.subr.mxu0 %v134_v17  ;;  %3195 = vmatpush3.msra.mxu1 %v4582_v18  ;;  %v4688_v52 = vld [vmem:[#allocation11 + $0x20] sm:$0xff]  ;;  %v4692_v53 = vld [vmem:[#allocation11 + $0x18] sm:$0xff]  ;;  %v4696_v54 = vld [vmem:[#allocation11 + $0x10] sm:$0xff] }
  0x5e   :  { %3151 = vmatpush3.msra.mxu0 %v134_v17  ;;  %3196 = vmatprep.subr.mxu1 %v5858_v0  ;;  %v4702_v55 = vld [vmem:[#allocation11 + $0x8] sm:$0xff]  ;;  %v4706_v56 = vld [vmem:[#allocation11] sm:$0xff]  ;;  %v4711_v57 = vld [vmem:[#allocation9 + $0x78] sm:$0xff] }
  0x5f   :  { %3152 = vmatprep.subr.mxu0 %v133_v19  ;;  %3197 = vmatpush3.msra.mxu1 %v4586_v20  ;;  %v4719_v58 = vld [vmem:[#allocation9 + $0x70] sm:$0xff]  ;;  %v4725_v59 = vld [vmem:[#allocation9 + $0x68] sm:$0xff]  ;;  %v4731_v60 = vld [vmem:[#allocation9 + $0x60] sm:$0xff] }
  0x60   :  { %3153 = vmatpush3.msra.mxu0 %v133_v19  ;;  %3198 = vmatprep.subr.mxu1 %v5858_v0  ;;  %v4737_v61 = vld [vmem:[#allocation9 + $0x58] sm:$0xff]  ;;  %v4743_v62 = vld [vmem:[#allocation9 + $0x50] sm:$0xff]  ;;  %v4746_v63 = vld [vmem:[#allocation9 + $0x48] sm:$0xff] }
  0x61   :  { %3154 = vmatprep.subr.mxu0 %v132_v21  ;;  %3199 = vmatpush3.msra.mxu1 %v4590_v22  ;;  %v4752_v1 = vld [vmem:[#allocation9 + $0x40] sm:$0xff]  ;;  %v4758_v3 = vld [vmem:[#allocation9 + $0x38] sm:$0xff]  ;;  %v4764_v5 = vld [vmem:[#allocation9 + $0x30] sm:$0xff] }
  0x62   :  { %3155 = vmatpush3.msra.mxu0 %v132_v21  ;;  %3200 = vmatprep.subr.mxu1 %v5858_v0  ;;  %v4770_v7 = vld [vmem:[#allocation9 + $0x28] sm:$0xff]  ;;  %v4776_v9 = vld [vmem:[#allocation9 + $0x20] sm:$0xff]  ;;  %v4782_v11 = vld [vmem:[#allocation9 + $0x18] sm:$0xff] }
  0x63   :  { %3156 = vmatprep.subr.mxu0 %v131_v23  ;;  %3201 = vmatpush3.msra.mxu1 %v4594_v24  ;;  %v4788_v13 = vld [vmem:[#allocation9 + $0x10] sm:$0xff]  ;;  %v4794_v15 = vld [vmem:[#allocation9 + $0x8] sm:$0xff]  ;;  %v4800_v17 = vld [vmem:[#allocation9] sm:$0xff] }
  0x64   :  { %3157 = vmatpush3.msra.mxu0 %v131_v23  ;;  %3202 = vmatprep.subr.mxu1 %v5858_v0  ;;  %5903 = vst [vmem:[#allocation26_spill] sm:$0xff] %v4788_v13  ;;  %5904 = vst [vmem:[#allocation27_spill] sm:$0xff] %v4794_v15  ;;  %v2665_v19 = vld [vmem:[#allocation6] ss:$0 sm:$0xff] }
  0x65   :  { %3158 = vmatprep.subr.mxu0 %v130_v25  ;;  %3203 = vmatpush3.msra.mxu1 %v4598_v26  ;;  %5905 = vst [vmem:[#allocation28_spill] sm:$0xff] %v4800_v17 }
  0x66   :  { %3159 = vmatpush3.msra.mxu0 %v130_v25  ;;  %3204 = vmatprep.subr.mxu1 %v5858_v0 }
  0x67   :  { %3160 = vmatprep.subr.mxu0 %v129_v27  ;;  %3205 = vmatpush3.msra.mxu1 %v4602_v28 }
  0x68   :  { %3161 = vmatpush3.msra.mxu0 %v129_v27  ;;  %3206 = vmatprep.subr.mxu1 %v5858_v0 }
  0x69   :  { %3162 = vmatprep.subr.mxu0 %v128_v29  ;;  %3207 = vmatpush3.msra.mxu1 %v4606_v30 }
  0x6a   :  { %3163 = vmatpush3.msra.mxu0 %v128_v29  ;;  %3208 = vmatprep.subr.mxu1 %v5858_v0 }
  0x6b   :  { %3164 = vmatprep.subr.mxu0 %v127_v31  ;;  %3166 = vmatprep.mubr.f32.mxu0 %v119_v32 }
  0x6c   :  { %3165 = vmatpush3.msra.mxu0 %v127_v31  ;;  %3209 = vmatpush3.msra.mxu1 %v4614_v33 }
  0x6d   :  { %3167 = vmatmul.mubr.f32.vlgmr.msra.gmra.mxu0 %v120_v34  ;;  %3211 = vmatmul.mubr.f32.vlgmr.msra.gmra.mxu1 %v5858_v0 }
  0x6e   :  { %3169 = vmatprep.mubr.f32.mxu0 %v121_v35  ;;  %3213 = vmatprep.subr.mxu0 %v5858_v0 }
  0x6f   :  { %3214 = vmatpush3.msra.mxu0 %v4624_v36  ;;  %3248 = vmatprep.subr.mxu1 %v5858_v0 }
  0x70   :  { %3215 = vmatprep.subr.mxu0 %v5858_v0  ;;  %3280 = vmatprep.mubr.msk.f32.mxu1 %vm4462_vm0, %v5858_v0 }
  0x71   :  { %3170 = vmatmul.mubr.f32.gmra.mxu0 %v122_v37  ;;  %3249 = vmatpush3.msra.mxu1 %v4711_v57 }
  0x72   :  { %3172 = vmatprep.mubr.f32.mxu0 %v123_v38  ;;  %3216 = vmatpush3.msra.mxu0 %v4635_v39 }
  0x73   :  { %3217 = vmatprep.subr.mxu0 %v5858_v0  ;;  %3250 = vmatprep.subr.mxu1 %v5858_v0 }
  0x74   :  { %3218 = vmatpush3.msra.mxu0 %v4641_v40  ;;  %3251 = vmatpush3.msra.mxu1 %v4719_v58 }
  0x75   :  { %3173 = vmatmul.mubr.f32.gmra.mxu0 %v124_v41  ;;  %3219 = vmatprep.subr.mxu0 %v5858_v0 }
  0x76   :  { %3175 = vmatprep.mubr.f32.mxu0 %v125_v42  ;;  %3220 = vmatpush3.msra.mxu0 %v4651_v43 }
  0x77   :  { %3221 = vmatprep.subr.mxu0 %v5858_v0  ;;  %3252 = vmatprep.subr.mxu1 %v5858_v0 }
  0x78   :  { %3222 = vmatpush3.msra.mxu0 %v4655_v44  ;;  %3253 = vmatpush3.msra.mxu1 %v4725_v59 }
  0x79   :  { %3176 = vmatmul.mubr.f32.gmra.mxu0 %v126_v45  ;;  %3223 = vmatprep.subr.mxu0 %v5858_v0 }
  0x7a   :  { %3224 = vmatpush3.msra.mxu0 %v4662_v46  ;;  %3245 = vmatprep.mubr.msk.f32.mxu0 %vm4462_vm0, %v5858_v0 }
  0x7b   :  { %3225 = vmatprep.subr.mxu0 %v5858_v0  ;;  %3254 = vmatprep.subr.mxu1 %v5858_v0 }
  0x7c   :  { %3226 = vmatpush3.msra.mxu0 %v4666_v47  ;;  %3255 = vmatpush3.msra.mxu1 %v4731_v60 }
  0x7d   :  { %3227 = vmatprep.subr.mxu0 %v5858_v0  ;;  %3256 = vmatprep.subr.mxu1 %v5858_v0 }
  0x7e   :  { %3228 = vmatpush3.msra.mxu0 %v4672_v48  ;;  %3257 = vmatpush3.msra.mxu1 %v4737_v61 }
  0x7f   :  { %3229 = vmatprep.subr.mxu0 %v5858_v0  ;;  %3258 = vmatprep.subr.mxu1 %v5858_v0 }
  0x80   :  { %3230 = vmatpush3.msra.mxu0 %v4676_v49  ;;  %3259 = vmatpush3.msra.mxu1 %v4743_v62 }
  0x81   :  { %3231 = vmatprep.subr.mxu0 %v5858_v0  ;;  %3260 = vmatprep.subr.mxu1 %v5858_v0 }
  0x82   :  { %3232 = vmatpush3.msra.mxu0 %v4680_v50  ;;  %3261 = vmatpush3.msra.mxu1 %v4746_v63 }
  0x83   :  { %3233 = vmatprep.subr.mxu0 %v5858_v0  ;;  %3262 = vmatprep.subr.mxu1 %v5858_v0 }
  0x84   :  { %3234 = vmatpush3.msra.mxu0 %v4684_v51  ;;  %3263 = vmatpush3.msra.mxu1 %v4752_v1 }
  0x85   :  { %3235 = vmatprep.subr.mxu0 %v5858_v0  ;;  %3264 = vmatprep.subr.mxu1 %v5858_v0 }
  0x86   :  { %3236 = vmatpush3.msra.mxu0 %v4688_v52  ;;  %3265 = vmatpush3.msra.mxu1 %v4758_v3 }
  0x87   :  { %3237 = vmatprep.subr.mxu0 %v5858_v0  ;;  %3266 = vmatprep.subr.mxu1 %v5858_v0 }
  0x88   :  { %3238 = vmatpush3.msra.mxu0 %v4692_v53  ;;  %3267 = vmatpush3.msra.mxu1 %v4764_v5 }
  0x89   :  { %3239 = vmatprep.subr.mxu0 %v5858_v0  ;;  %3268 = vmatprep.subr.mxu1 %v5858_v0 }
  0x8a   :  { %3240 = vmatpush3.msra.mxu0 %v4696_v54  ;;  %3269 = vmatpush3.msra.mxu1 %v4770_v7 }
  0x8b   :  { %3241 = vmatprep.subr.mxu0 %v5858_v0  ;;  %3270 = vmatprep.subr.mxu1 %v5858_v0 }
  0x8c   :  { %3242 = vmatpush3.msra.mxu0 %v4702_v55  ;;  %3271 = vmatpush3.msra.mxu1 %v4776_v9 }
  0x8d   :  { %3243 = vmatprep.subr.mxu0 %v5858_v0  ;;  %3272 = vmatprep.subr.mxu1 %v5858_v0 }
  0x8e   :  { %3244 = vmatpush3.msra.mxu0 %v4706_v56  ;;  %3273 = vmatpush3.msra.mxu1 %v4782_v11 }
  0x8f   :  { %3246 = vmatmul.mubr.f32.vlgmr.msra.gmra.mxu0 %v5858_v0  ;;  %3283 = vmatprep.subr.mxu0 %v5858_v0 }
  0x90   :  { %3284 = vmatpush3.msra.mxu0 %v4552_v2  ;;  %3315 = vmatprep.mubr.msk.f32.mxu0 %vm4462_vm0, %v5858_v0 }
  0x91   :  { %3285 = vmatprep.subr.mxu0 %v5858_v0  ;;  %3274 = vmatprep.subr.mxu1 %v5858_v0 }
  0x92   :  { %3286 = vmatpush3.msra.mxu0 %v4555_v4  ;;  %3275 = vmatpush3.msra.mxu1 %v4788_v13 }
  0x93   :  { %3287 = vmatprep.subr.mxu0 %v5858_v0  ;;  %3276 = vmatprep.subr.mxu1 %v5858_v0 }
  0x94   :  { %3288 = vmatpush3.msra.mxu0 %v4558_v6  ;;  %3277 = vmatpush3.msra.mxu1 %v4794_v15 }
  0x95   :  { %3289 = vmatprep.subr.mxu0 %v5858_v0  ;;  %3278 = vmatprep.subr.mxu1 %v5858_v0 }
  0x96   :  { %3290 = vmatpush3.msra.mxu0 %v4562_v8  ;;  %3279 = vmatpush3.msra.mxu1 %v4800_v17 }
  0x97   :  { %3291 = vmatprep.subr.mxu0 %v5858_v0  ;;  %3318 = vmatprep.subr.mxu1 %v5858_v0 }
  0x98   :  { %3292 = vmatpush3.msra.mxu0 %v4566_v10 }
  0x99   :  { %3293 = vmatprep.subr.mxu0 %v5858_v0 }
  0x9a   :  { %3294 = vmatpush3.msra.mxu0 %v4570_v12 }
  0x9b   :  { %3295 = vmatprep.subr.mxu0 %v5858_v0 }
  0x9c   :  { %3296 = vmatpush3.msra.mxu0 %v4574_v14 }
  0x9d   :  { %3297 = vmatprep.subr.mxu0 %v5858_v0 }
  0x9e   :  { %3298 = vmatpush3.msra.mxu0 %v4578_v16 }
  0x9f   :  { %3299 = vmatprep.subr.mxu0 %v5858_v0 }
  0xa0   :  { %3300 = vmatpush3.msra.mxu0 %v4582_v18 }
  0xa1   :  { %3301 = vmatprep.subr.mxu0 %v5858_v0 }
  0xa2   :  { %3302 = vmatpush3.msra.mxu0 %v4586_v20 }
  0xa3   :  { %3303 = vmatprep.subr.mxu0 %v5858_v0 }
  0xa4   :  { %3304 = vmatpush3.msra.mxu0 %v4590_v22 }
  0xa5   :  { %3305 = vmatprep.subr.mxu0 %v5858_v0 }
  0xa6   :  { %3306 = vmatpush3.msra.mxu0 %v4594_v24 }
  0xa7   :  { %3307 = vmatprep.subr.mxu0 %v5858_v0 }
  0xa8   :  { %3308 = vmatpush3.msra.mxu0 %v4598_v26 }
  0xa9   :  { %3309 = vmatprep.subr.mxu0 %v5858_v0 }
  0xaa   :  { %3310 = vmatpush3.msra.mxu0 %v4602_v28 }
  0xab   :  { %3311 = vmatprep.subr.mxu0 %v5858_v0 }
  0xac   :  { %3312 = vmatpush3.msra.mxu0 %v4606_v30 }
  0xad   :  { %3313 = vmatprep.subr.mxu0 %v5858_v0 }
  0xae   :  { %3314 = vmatpush3.msra.mxu0 %v4614_v33 }
  0xaf   :  { %3353 = vmatprep.subr.mxu0 %v5858_v0 }
 0x12d   :  { %v3168_v21 = vpop.f32.mrf.mxu0  ;;  %v372_v23 = vpop.f32.mrf.mxu1 }
 0x12e   :  { %v4809_v25 = vadd.f32 %v3168_v21, %v2665_v19  ;;  %v377_v27 = vrot.slane %v372_v23, 1  ;;  %v379_v35 = vrot.slane %v372_v23, 3  ;;  %v378_v38 = vrot.slane %v372_v23, 2 }
 0x12f   :  { %v216_v29 = vpop.f32.mrf.mxu0  ;;  %v3212_v31 = vpop.f32.mrf.mxu1  ;;  %v381_v33 = vrot.slane %v372_v23, 5  ;;  %v383_v24 = vrot.slane %v372_v23, 7 }
 0x130   :  { %5906 = vst [vmem:[#allocation29_spill] sm:$0xff] %v4809_v25  ;;  %v393_v32 = vadd.f32 %v377_v27, %v4809_v25  ;;  %v4812_v34 = vadd.f32 %v2665_v19, %v216_v29  ;;  %v380_v31 = vrot.slane %v372_v23, 4 }
 0x131   :  { %v3171_v37 = vpop.f32.mrf.mxu0 }
 0x132   :  { %v4814_v41 = vadd.f32 %v3171_v37, %v2665_v19  ;;  %4098 = vtanh.f32 %v393_v32  ;;  %v392_v42 = vadd.f32 %v372_v23, %v4812_v34 }
 0x133   :  { %v226_v45 = vpop.f32.mrf.mxu0 }
 0x134   :  { %v4817_v0 = vadd.f32 %v2665_v19, %v226_v45  ;;  %v395_v30 = vadd.f32 %v379_v35, %v4814_v41  ;;  %4100 = vtanh.f32 %v392_v42 }
 0x135   :  { %v3174_v21 = vpop.f32.mrf.mxu0 }
 0x136   :  { %v4820_v28 = vadd.f32 %v3174_v21, %v2665_v19  ;;  %v394_v27 = vadd.f32 %v378_v38, %v4817_v0  ;;  %v382_v21 = vrot.slane %v372_v23, 6 }
 0x137   :  { %v236_v29 = vpop.f32.mrf.mxu0 }
 0x138   :  { %v4823_v26 = vadd.f32 %v2665_v19, %v236_v29  ;;  %4102 = vtanh.f32 %v394_v27  ;;  %v397_v37 = vadd.f32 %v381_v33, %v4820_v28 }
 0x139   :  { %v3177_v32 = vpop.f32.mrf.mxu0  ;;  %4104 = vtanh.f32 %v395_v30 }
 0x13a   :  { %v4826_v45 = vadd.f32 %v3177_v32, %v2665_v19  ;;  %v396_v22 = vadd.f32 %v380_v31, %v4823_v26 }
 0x13b   :  { %v246_v35 = vpop.f32.mrf.mxu0 }
 0x13c   :  { %v4829_v20 = vadd.f32 %v2665_v19, %v246_v35  ;;  %v399_v38 = vadd.f32 %v383_v24, %v4826_v45  ;;  %4106 = vtanh.f32 %v396_v22 }
 0x13d   :  { %4108 = vtanh.f32 %v397_v37 }
 0x13e   :  { %v398_v42 = vadd.f32 %v382_v21, %v4829_v20  ;;  %4110 = vtanh.f32 %v399_v38 }
 0x13f   :  { %v4099_v27 = vpop.eup %4098 }
 0x140   :  { %4112 = vtanh.f32 %v398_v42  ;;  %v486_v33 = vrot.slane %v4099_v27, 7 }
 0x141   :  { %v4101_v30 = vpop.eup %4100 }
 0x142   :  { %v488_v19 = vsel %vm487_vm1, %v486_v33, %v4101_v30 }
 0x145   :  { %v4103_v29 = vpop.eup %4102 }
 0x146   :  { %v4105_v32 = vpop.eup %4104  ;;  %v489_v31 = vrot.slane %v4103_v29, 6 }
 0x147   :  { %v492_v22 = vrot.slane %v4105_v32, 5 }
 0x148   :  { %v491_v23 = vsel %vm490_vm2, %v489_v31, %v488_v19  ;;  %v5907_v19 = vmov 0.0  }
 0x149   :  { %v4107_v24 = vpop.eup %4106  ;;  %v494_v21 = vsel %vm493_vm3, %v492_v22, %v491_v23 }
 0x14a   :  { %v4109_v37 = vpop.eup %4108  ;;  %v495_v35 = vrot.slane %v4107_v24, 4  ;;  %v4908_v24 = vld [vmem:[#allocation12] ss:$0 sm:$0xff] }
 0x14b   :  { %v4111_v38 = vpop.eup %4110  ;;  %v498_v18 = vrot.slane %v4109_v37, 3 }
 0x14c   :  { %v497_v42 = vsel %vm496_vm4, %v495_v35, %v494_v21  ;;  %v504_v30 = vrot.slane %v4111_v38, 1 }
 0x14d   :  { %v4113_v27 = vpop.eup %4112  ;;  %v500_v33 = vsel %vm499_vm5, %v498_v18, %v497_v42 }
 0x14e   :  { %v501_v29 = vrot.slane %v4113_v27, 2 }
 0x14f   :  { %v474_v18 = vpop.f32.mrf.mxu0 }
 0x150   :  { %v503_v31 = vsel %vm502_vm6, %v501_v29, %v500_v33 }
 0x151   :  { %v506_v32 = vsel %vm505_vm7, %v504_v30, %v503_v31  ;;  %v3247_v23 = vpop.f32.mrf.mxu0 }
 0x152   :  { %3281 = vmatmul.mubr.f32.vlgmr.msra.gmra.mxu1 %v506_v32  ;;  %3316 = vmatmul.mubr.f32.vlgmr.msra.gmra.mxu0 %v506_v32 }
 0x153   :  { %3319 = vmatpush3.msra.mxu1 %v4624_v36  ;;  %3354 = vmatpush3.msra.mxu0 %v4711_v57 }
 0x154   :  { %3320 = vmatprep.subr.mxu1 %v5907_v19  ;;  %3355 = vmatprep.subr.mxu0 %v5907_v19 }
 0x155   :  { %3321 = vmatpush3.msra.mxu1 %v4635_v39  ;;  %3356 = vmatpush3.msra.mxu0 %v4719_v58 }
 0x156   :  { %3322 = vmatprep.subr.mxu1 %v5907_v19  ;;  %3357 = vmatprep.subr.mxu0 %v5907_v19 }
 0x157   :  { %3323 = vmatpush3.msra.mxu1 %v4641_v40  ;;  %3358 = vmatpush3.msra.mxu0 %v4725_v59 }
 0x158   :  { %3324 = vmatprep.subr.mxu1 %v5907_v19  ;;  %3359 = vmatprep.subr.mxu0 %v5907_v19 }
 0x159   :  { %3325 = vmatpush3.msra.mxu1 %v4651_v43  ;;  %3360 = vmatpush3.msra.mxu0 %v4731_v60 }
 0x15a   :  { %3326 = vmatprep.subr.mxu1 %v5907_v19  ;;  %3361 = vmatprep.subr.mxu0 %v5907_v19 }
 0x15b   :  { %3327 = vmatpush3.msra.mxu1 %v4655_v44  ;;  %3362 = vmatpush3.msra.mxu0 %v4737_v61 }
 0x15c   :  { %3328 = vmatprep.subr.mxu1 %v5907_v19  ;;  %3363 = vmatprep.subr.mxu0 %v5907_v19 }
 0x15d   :  { %3329 = vmatpush3.msra.mxu1 %v4662_v46  ;;  %3364 = vmatpush3.msra.mxu0 %v4743_v62 }
 0x15e   :  { %3330 = vmatprep.subr.mxu1 %v5907_v19  ;;  %3365 = vmatprep.subr.mxu0 %v5907_v19 }
 0x15f   :  { %3331 = vmatpush3.msra.mxu1 %v4666_v47  ;;  %3366 = vmatpush3.msra.mxu0 %v4746_v63 }
 0x160   :  { %3332 = vmatprep.subr.mxu1 %v5907_v19  ;;  %3367 = vmatprep.subr.mxu0 %v5907_v19 }
 0x161   :  { %3333 = vmatpush3.msra.mxu1 %v4672_v48  ;;  %3368 = vmatpush3.msra.mxu0 %v4752_v1 }
 0x162   :  { %3334 = vmatprep.subr.mxu1 %v5907_v19  ;;  %3369 = vmatprep.subr.mxu0 %v5907_v19 }
 0x163   :  { %3335 = vmatpush3.msra.mxu1 %v4676_v49  ;;  %3370 = vmatpush3.msra.mxu0 %v4758_v3 }
 0x164   :  { %3336 = vmatprep.subr.mxu1 %v5907_v19  ;;  %3371 = vmatprep.subr.mxu0 %v5907_v19 }
 0x165   :  { %3337 = vmatpush3.msra.mxu1 %v4680_v50  ;;  %3372 = vmatpush3.msra.mxu0 %v4764_v5 }
 0x166   :  { %3338 = vmatprep.subr.mxu1 %v5907_v19  ;;  %3373 = vmatprep.subr.mxu0 %v5907_v19 }
 0x167   :  { %3339 = vmatpush3.msra.mxu1 %v4684_v51  ;;  %3374 = vmatpush3.msra.mxu0 %v4770_v7 }
 0x168   :  { %3340 = vmatprep.subr.mxu1 %v5907_v19  ;;  %3350 = vmatprep.mubr.msk.f32.mxu1 %vm4462_vm0, %v5907_v19 }
 0x169   :  { %3341 = vmatpush3.msra.mxu1 %v4688_v52  ;;  %3375 = vmatprep.subr.mxu0 %v5907_v19 }
 0x16a   :  { %3342 = vmatprep.subr.mxu1 %v5907_v19  ;;  %3376 = vmatpush3.msra.mxu0 %v4776_v9 }
 0x16b   :  { %3343 = vmatpush3.msra.mxu1 %v4692_v53  ;;  %3377 = vmatprep.subr.mxu0 %v5907_v19 }
 0x16c   :  { %3344 = vmatprep.subr.mxu1 %v5907_v19  ;;  %3378 = vmatpush3.msra.mxu0 %v4782_v11 }
 0x16d   :  { %3345 = vmatpush3.msra.mxu1 %v4696_v54  ;;  %3379 = vmatprep.subr.mxu0 %v5907_v19 }
 0x16e   :  { %3346 = vmatprep.subr.mxu1 %v5907_v19  ;;  %3380 = vmatpush3.msra.mxu0 %v4788_v13 }
 0x16f   :  { %3347 = vmatpush3.msra.mxu1 %v4702_v55  ;;  %3381 = vmatprep.subr.mxu0 %v5907_v19 }
 0x170   :  { %3348 = vmatprep.subr.mxu1 %v5907_v19  ;;  %3382 = vmatpush3.msra.mxu0 %v4794_v15 }
 0x171   :  { %3349 = vmatpush3.msra.mxu1 %v4706_v56  ;;  %3383 = vmatprep.subr.mxu0 %v5907_v19 }
 0x172   :  { %3388 = vmatprep.subr.mxu1 %v5907_v19  ;;  %3384 = vmatpush3.msra.mxu0 %v4800_v17 }
 0x173   :  { %3385 = vmatprep.mubr.msk.f32.mxu0 %vm4462_vm0, %v5907_v19  ;;  %3423 = vmatprep.subr.mxu0 %v5907_v19 }
 0x212   :  { %v574_v22 = vpop.f32.mrf.mxu1  ;;  %v652_v37 = vpop.f32.mrf.mxu0 }
 0x213   :  { %v575_v35 = vadd.f32 %v574_v22, %v474_v18  ;;  %v657_v21 = vrot.slane %v652_v37, 7  ;;  %v658_v38 = vrot.slane %v652_v37, 1  ;;  %v659_v42 = vrot.slane %v652_v37, 2 }
 0x214   :  { %v660_v27 = vrot.slane %v652_v37, 3  ;;  %v673_v29 = vadd.f32 %v652_v37, %v4809_v25  ;;  %v3282_v33 = vpop.f32.mrf.mxu1  ;;  %v3317_v30 = vpop.f32.mrf.mxu0  ;;  %v661_v31 = vrot.slane %v652_v37, 4  ;;  %v662_v15 = vrot.slane %v652_v37, 5 }
 0x215   :  { %v584_v32 = vadd.f32 %v4908_v24, %v575_v35  ;;  %v672_v23 = vadd.f32 %v657_v21, %v4812_v34  ;;  %v674_v17 = vadd.f32 %v658_v38, %v4817_v0  ;;  %v663_v13 = vrot.slane %v652_v37, 6 }
 0x216   :  { %4114 = vtanh.f32 %v673_v29  ;;  %v675_v18 = vadd.f32 %v659_v42, %v4814_v41  ;;  %v676_v22 = vadd.f32 %v660_v27, %v4823_v26  ;;  %v677_v25 = vadd.f32 %v661_v31, %v4820_v28 }
 0x217   :  { %4116 = vtanh.f32 %v584_v32  ;;  %v678_v33 = vadd.f32 %v662_v15, %v4829_v20  ;;  %v679_v35 = vadd.f32 %v663_v13, %v4826_v45 }
 0x218   :  { %4118 = vtanh.f32 %v672_v23 }
 0x219   :  { %4120 = vtanh.f32 %v674_v17 }
 0x21a   :  { %4122 = vtanh.f32 %v675_v18 }
 0x21b   :  { %4124 = vtanh.f32 %v676_v22 }
 0x21c   :  { %4126 = vtanh.f32 %v677_v25 }
 0x21d   :  { %4128 = vtanh.f32 %v678_v33 }
 0x21e   :  { %4130 = vtanh.f32 %v679_v35 }
 0x223   :  { %v4115_v21 = vpop.eup %4114 }
 0x224   :  { %v4117_v37 = vpop.eup %4116 }
 0x225   :  { %v4119_v38 = vpop.eup %4118  ;;  %3351 = vmatmul.mubr.f32.vlgmr.msra.gmra.mxu1 %v4117_v37 }
 0x226   :  { %v4121_v42 = vpop.eup %4120  ;;  %3389 = vmatpush3.msra.mxu1 %v4552_v2  ;;  %v766_v27 = vrot.slane %v4119_v38, 1  ;;  %3420 = vmatprep.mubr.msk.f32.mxu1 %vm4462_vm0, %v5907_v19 }
 0x227   :  { %v4123_v17 = vpop.eup %4122  ;;  %3390 = vmatprep.subr.mxu1 %v5907_v19  ;;  %v768_v13 = vrot.slane %v4121_v42, 7 }
 0x228   :  { %v4125_v15 = vpop.eup %4124  ;;  %3391 = vmatpush3.msra.mxu1 %v4555_v4  ;;  %v767_v25 = vsel %vm487_vm1, %v4115_v21, %v766_v27  ;;  %v770_v29 = vrot.slane %v4123_v17, 6 }
 0x229   :  { %v4127_v30 = vpop.eup %4126  ;;  %3392 = vmatprep.subr.mxu1 %v5907_v19  ;;  %v769_v31 = vsel %vm490_vm2, %v768_v13, %v767_v25  ;;  %v772_v2 = vrot.slane %v4125_v15, 5  ;;  %v5042_v15 = vld [vmem:[#allocation8 + $0x68] sm:$0xff] }
 0x22a   :  { %v4129_v32 = vpop.eup %4128  ;;  %3393 = vmatpush3.msra.mxu1 %v4558_v6  ;;  %v771_v23 = vsel %vm493_vm3, %v770_v29, %v769_v31  ;;  %v774_v18 = vrot.slane %v4127_v30, 4 }
 0x22b   :  { %v4131_v22 = vpop.eup %4130  ;;  %3394 = vmatprep.subr.mxu1 %v5907_v19  ;;  %v773_v4 = vsel %vm496_vm4, %v772_v2, %v771_v23  ;;  %v776_v33 = vrot.slane %v4129_v32, 3  ;;  %v5921_v2 = vld [vmem:[#allocation29_spill] sm:$0xff] }
 0x22c   :  { %3395 = vmatpush3.msra.mxu1 %v4562_v8  ;;  %v775_v35 = vsel %vm499_vm5, %v774_v18, %v773_v4  ;;  %v778_v21 = vrot.slane %v4131_v22, 2  ;;  %v5908_v8 = vld [vmem:[#allocation18_spill] sm:$0xff] }
 0x22d   :  { %3396 = vmatprep.subr.mxu1 %v5907_v19  ;;  %v777_v37 = vsel %vm502_vm6, %v776_v33, %v775_v35  ;;  %v5049_v22 = vld [vmem:[#allocation8 + $0x60] sm:$0xff]  ;;  %v5055_v35 = vld [vmem:[#allocation8 + $0x58] sm:$0xff] }
 0x22e   :  { %3397 = vmatpush3.msra.mxu1 %v4566_v10  ;;  %v779_v6 = vsel %vm505_vm7, %v778_v21, %v777_v37  ;;  %v5909_v10 = vld [vmem:[#allocation19_spill] sm:$0xff] }
 0x22f   :  { %3386 = vmatmul.mubr.f32.vlgmr.msra.gmra.mxu0 %v779_v6  ;;  %3398 = vmatprep.subr.mxu1 %v5907_v19 }
 0x230   :  { %3399 = vmatpush3.msra.mxu1 %v4570_v12  ;;  %3424 = vmatpush3.msra.mxu0 %v4624_v36  ;;  %v5910_v12 = vld [vmem:[#allocation20_spill] sm:$0xff]  ;;  %v5913_v36 = vld [vmem:[#allocation23_spill] sm:$0xff] }
 0x231   :  { %3400 = vmatprep.subr.mxu1 %v5907_v19  ;;  %3425 = vmatprep.subr.mxu0 %v5907_v19 }
 0x232   :  { %3401 = vmatpush3.msra.mxu1 %v4574_v14  ;;  %3426 = vmatpush3.msra.mxu0 %v4635_v39  ;;  %v5911_v14 = vld [vmem:[#allocation21_spill] sm:$0xff]  ;;  %v5914_v39 = vld [vmem:[#allocation24_spill] sm:$0xff] }
 0x233   :  { %3402 = vmatprep.subr.mxu1 %v5907_v19  ;;  %3427 = vmatprep.subr.mxu0 %v5907_v19 }
 0x234   :  { %3403 = vmatpush3.msra.mxu1 %v4578_v16  ;;  %3428 = vmatpush3.msra.mxu0 %v4641_v40  ;;  %v5912_v16 = vld [vmem:[#allocation22_spill] sm:$0xff]  ;;  %v5915_v40 = vld [vmem:[#allocation25_spill] sm:$0xff] }
 0x235   :  { %3404 = vmatprep.subr.mxu1 %v5907_v19  ;;  %3429 = vmatprep.subr.mxu0 %v5907_v19 }
 0x236   :  { %3405 = vmatpush3.msra.mxu1 %v5908_v8  ;;  %3430 = vmatpush3.msra.mxu0 %v4651_v43  ;;  %v4996_v43 = vld [vmem:[#allocation2] sm:$0xff]  ;;  %v5065_v8 = vld [vmem:[#allocation8 + $0x48] sm:$0xff] }
 0x237   :  { %3406 = vmatprep.subr.mxu1 %v5907_v19  ;;  %3431 = vmatprep.subr.mxu0 %v5907_v19 }
 0x238   :  { %3407 = vmatpush3.msra.mxu1 %v5909_v10  ;;  %3432 = vmatpush3.msra.mxu0 %v4655_v44  ;;  %v5916_v44 = vld [vmem:[#allocation26_spill] sm:$0xff] }
 0x239   :  { %3408 = vmatprep.subr.mxu1 %v5907_v19  ;;  %3433 = vmatprep.subr.mxu0 %v5907_v19  ;;  %v5069_v10 = vld [vmem:[#allocation8 + $0x40] sm:$0xff] }
 0x23a   :  { %3409 = vmatpush3.msra.mxu1 %v5910_v12  ;;  %3434 = vmatpush3.msra.mxu0 %v4662_v46  ;;  %v5917_v46 = vld [vmem:[#allocation27_spill] sm:$0xff]  ;;  %v5073_v12 = vld [vmem:[#allocation8 + $0x38] sm:$0xff] }
 0x23b   :  { %3410 = vmatprep.subr.mxu1 %v5907_v19  ;;  %3435 = vmatprep.subr.mxu0 %v5907_v19 }
 0x23c   :  { %3411 = vmatpush3.msra.mxu1 %v5911_v14  ;;  %3436 = vmatpush3.msra.mxu0 %v4666_v47  ;;  %v5918_v47 = vld [vmem:[#allocation28_spill] sm:$0xff] }
 0x23d   :  { %3412 = vmatprep.subr.mxu1 %v5907_v19  ;;  %3437 = vmatprep.subr.mxu0 %v5907_v19  ;;  %v5077_v14 = vld [vmem:[#allocation8 + $0x30] sm:$0xff] }
 0x23e   :  { %3413 = vmatpush3.msra.mxu1 %v5912_v16  ;;  %3438 = vmatpush3.msra.mxu0 %v4672_v48 }
 0x23f   :  { %3414 = vmatprep.subr.mxu1 %v5907_v19  ;;  %3439 = vmatprep.subr.mxu0 %v5907_v19 }
 0x240   :  { %3415 = vmatpush3.msra.mxu1 %v5913_v36  ;;  %3440 = vmatpush3.msra.mxu0 %v4676_v49 }
 0x241   :  { %3416 = vmatprep.subr.mxu1 %v5907_v19  ;;  %3441 = vmatprep.subr.mxu0 %v5907_v19 }
 0x242   :  { %3417 = vmatpush3.msra.mxu1 %v5914_v39  ;;  %3442 = vmatpush3.msra.mxu0 %v4680_v50  ;;  %v5081_v39 = vld [vmem:[#allocation8 + $0x28] sm:$0xff] }
 0x243   :  { %3418 = vmatprep.subr.mxu1 %v5907_v19  ;;  %3443 = vmatprep.subr.mxu0 %v5907_v19 }
 0x244   :  { %3419 = vmatpush3.msra.mxu1 %v5915_v40  ;;  %3444 = vmatpush3.msra.mxu0 %v4684_v51 }
 0x245   :  { %3421 = vmatmul.mubr.f32.vlgmr.msra.gmra.mxu1 %v779_v6  ;;  %3445 = vmatprep.subr.mxu0 %v5907_v19  ;;  %v5061_v6 = vld [vmem:[#allocation8 + $0x50] sm:$0xff] }
 0x246   :  { %3446 = vmatpush3.msra.mxu0 %v4688_v52  ;;  %3455 = vmatprep.mubr.msk.f32.mxu0 %vm4462_vm0, %v5907_v19 }
 0x247   :  { %3447 = vmatprep.subr.mxu0 %v5907_v19  ;;  %3458 = vmatprep.subr.mxu1 %v5907_v19 }
 0x248   :  { %3448 = vmatpush3.msra.mxu0 %v4692_v53  ;;  %3459 = vmatpush3.msra.mxu1 %v4711_v57 }
 0x249   :  { %3449 = vmatprep.subr.mxu0 %v5907_v19  ;;  %3460 = vmatprep.subr.mxu1 %v5907_v19 }
 0x24a   :  { %3450 = vmatpush3.msra.mxu0 %v4696_v54  ;;  %3461 = vmatpush3.msra.mxu1 %v4719_v58 }
 0x24b   :  { %3451 = vmatprep.subr.mxu0 %v5907_v19  ;;  %3462 = vmatprep.subr.mxu1 %v5907_v19 }
 0x24c   :  { %3452 = vmatpush3.msra.mxu0 %v4702_v55  ;;  %3463 = vmatpush3.msra.mxu1 %v4725_v59  ;;  %v5031_v55 = vld [vmem:[#allocation8 + $0x78] sm:$0xff] }
 0x24d   :  { %3453 = vmatprep.subr.mxu0 %v4996_v43  ;;  %3464 = vmatprep.subr.mxu1 %v4996_v43  ;;  %5919 = vst [vmem:[#allocation18_spill] sm:$0xff] %v5031_v55 }
 0x24e   :  { %3454 = vmatpush3.msra.mxu0 %v4706_v56  ;;  %3465 = vmatpush3.msra.mxu1 %v4731_v60  ;;  %v5037_v56 = vld [vmem:[#allocation8 + $0x70] sm:$0xff] }
 0x24f   :  { %3493 = vmatprep.subr.mxu0 %v4996_v43  ;;  %3466 = vmatprep.subr.mxu1 %v4996_v43  ;;  %5920 = vst [vmem:[#allocation19_spill] sm:$0xff] %v5037_v56 }
 0x250   :  { %3467 = vmatpush3.msra.mxu1 %v4737_v61  ;;  %3490 = vmatprep.mubr.msk.f32.mxu1 %vm4462_vm0, %v4996_v43 }
 0x251   :  { %3468 = vmatprep.subr.mxu1 %v4996_v43 }
 0x252   :  { %3469 = vmatpush3.msra.mxu1 %v4743_v62 }
 0x253   :  { %3470 = vmatprep.subr.mxu1 %v4996_v43 }
 0x254   :  { %3471 = vmatpush3.msra.mxu1 %v4746_v63 }
 0x255   :  { %3472 = vmatprep.subr.mxu1 %v4996_v43 }
 0x256   :  { %3473 = vmatpush3.msra.mxu1 %v4752_v1 }
 0x257   :  { %3474 = vmatprep.subr.mxu1 %v4996_v43 }
 0x258   :  { %3475 = vmatpush3.msra.mxu1 %v4758_v3 }
 0x259   :  { %3476 = vmatprep.subr.mxu1 %v4996_v43 }
 0x25a   :  { %3477 = vmatpush3.msra.mxu1 %v4764_v5 }
 0x25b   :  { %3478 = vmatprep.subr.mxu1 %v4996_v43 }
 0x25c   :  { %3479 = vmatpush3.msra.mxu1 %v4770_v7 }
 0x25d   :  { %3480 = vmatprep.subr.mxu1 %v4996_v43 }
 0x25e   :  { %3481 = vmatpush3.msra.mxu1 %v4776_v9 }
 0x25f   :  { %3482 = vmatprep.subr.mxu1 %v4996_v43 }
 0x260   :  { %3483 = vmatpush3.msra.mxu1 %v4782_v11 }
 0x261   :  { %3484 = vmatprep.subr.mxu1 %v4996_v43 }
 0x262   :  { %3485 = vmatpush3.msra.mxu1 %v5916_v44 }
 0x263   :  { %3486 = vmatprep.subr.mxu1 %v4996_v43 }
 0x264   :  { %3487 = vmatpush3.msra.mxu1 %v5917_v46 }
 0x265   :  { %3488 = vmatprep.subr.mxu1 %v4996_v43 }
 0x266   :  { %3489 = vmatpush3.msra.mxu1 %v5918_v47 }
 0x267   :  { %3528 = vmatprep.subr.mxu1 %v4996_v43 }
 0x2e5   :  { %v754_v48 = vpop.f32.mrf.mxu1 }
 0x2e7   :  { %v3352_v49 = vpop.f32.mrf.mxu1 }
 0x2ef   :  { %v847_v50 = vpop.f32.mrf.mxu0 }
 0x2f0   :  { %v848_v51 = vadd.f32 %v847_v50, %v754_v48  ;;  %v5085_v50 = vld [vmem:[#allocation8 + $0x20] sm:$0xff] }
 0x2f1   :  { %v3387_v52 = vpop.f32.mrf.mxu0  ;;  %5922 = vst [vmem:[#allocation20_spill] sm:$0xff] %v5085_v50 }
 0x2f2   :  { %v851_v53 = vadd.f32 %v4908_v24, %v848_v51 }
 0x2f4   :  { %4132 = vtanh.f32 %v851_v53 }
 0x301   :  { %v4133_v54 = vpop.eup %4132 }
 0x302   :  { %3456 = vmatmul.mubr.f32.vlgmr.msra.gmra.mxu0 %v4133_v54  ;;  %v5089_v54 = vld [vmem:[#allocation8 + $0x18] sm:$0xff] }
 0x303   :  { %3494 = vmatpush3.msra.mxu0 %v5031_v55  ;;  %3525 = vmatprep.mubr.msk.f32.mxu0 %vm4462_vm0, %v4996_v43 }
 0x304   :  { %3495 = vmatprep.subr.mxu0 %v4996_v43 }
 0x305   :  { %3496 = vmatpush3.msra.mxu0 %v5037_v56  ;;  %v919_v19 = vpop.f32.mrf.mxu1 }
 0x306   :  { %v924_v38 = vrot.slane %v919_v19, 6  ;;  %v925_v42 = vrot.slane %v919_v19, 7  ;;  %v926_v27 = vrot.slane %v919_v19, 1  ;;  %v927_v17 = vrot.slane %v919_v19, 2  ;;  %3497 = vmatprep.subr.mxu0 %v4996_v43 }
 0x307   :  { %v941_v13 = vadd.f32 %v919_v19, %v4817_v0  ;;  %3498 = vmatpush3.msra.mxu0 %v5042_v15  ;;  %v3422_v25 = vpop.f32.mrf.mxu1  ;;  %v928_v29 = vrot.slane %v919_v19, 3  ;;  %v929_v30 = vrot.slane %v919_v19, 4  ;;  %v930_v23 = vrot.slane %v919_v19, 5 }
 0x308   :  { %v939_v31 = vadd.f32 %v924_v38, %v4812_v34  ;;  %v940_v32 = vadd.f32 %v925_v42, %v5921_v2  ;;  %3499 = vmatprep.subr.mxu0 %v4996_v43  ;;  %v942_v18 = vadd.f32 %v926_v27, %v4814_v41  ;;  %v943_v4 = vadd.f32 %v927_v17, %v4823_v26  ;;  %v5095_v25 = vld [vmem:[#allocation8 + $0x10] sm:$0xff] }
 0x309   :  { %4134 = vtanh.f32 %v941_v13  ;;  %3500 = vmatpush3.msra.mxu0 %v5049_v22  ;;  %v944_v33 = vadd.f32 %v928_v29, %v4820_v28  ;;  %v945_v21 = vadd.f32 %v929_v30, %v4829_v20  ;;  %v946_v37 = vadd.f32 %v930_v23, %v4826_v45  ;;  %v5101_v23 = vld [vmem:[#allocation8 + $0x8] sm:$0xff] }
 0x30a   :  { %4136 = vtanh.f32 %v939_v31  ;;  %3501 = vmatprep.subr.mxu0 %v4996_v43 }
 0x30b   :  { %4138 = vtanh.f32 %v940_v32  ;;  %3502 = vmatpush3.msra.mxu0 %v5055_v35 }
 0x30c   :  { %3503 = vmatprep.subr.mxu0 %v4996_v43  ;;  %4140 = vtanh.f32 %v942_v18 }
 0x30d   :  { %3504 = vmatpush3.msra.mxu0 %v5061_v6  ;;  %4142 = vtanh.f32 %v943_v4 }
 0x30e   :  { %3505 = vmatprep.subr.mxu0 %v4996_v43  ;;  %4144 = vtanh.f32 %v944_v33 }
 0x30f   :  { %3506 = vmatpush3.msra.mxu0 %v5065_v8  ;;  %4146 = vtanh.f32 %v945_v21  ;;  %v5107_v21 = vld [vmem:[#allocation8] sm:$0xff] }
 0x310   :  { %3507 = vmatprep.subr.mxu0 %v4996_v43  ;;  %4148 = vtanh.f32 %v946_v37 }
 0x311   :  { %3508 = vmatpush3.msra.mxu0 %v5069_v10 }
 0x312   :  { %3509 = vmatprep.subr.mxu0 %v4996_v43 }
 0x313   :  { %3510 = vmatpush3.msra.mxu0 %v5073_v12 }
 0x314   :  { %3511 = vmatprep.subr.mxu0 %v4996_v43 }
 0x315   :  { %3512 = vmatpush3.msra.mxu0 %v5077_v14 }
 0x316   :  { %v4135_v16 = vpop.eup %4134  ;;  %3513 = vmatprep.subr.mxu0 %v4996_v43 }
 0x317   :  { %v4137_v36 = vpop.eup %4136  ;;  %3514 = vmatpush3.msra.mxu0 %v5081_v39 }
 0x318   :  { %v4139_v40 = vpop.eup %4138  ;;  %3515 = vmatprep.subr.mxu0 %v4996_v43  ;;  %v1033_v48 = vrot.slane %v4137_v36, 2  ;;  %v5117_v36 = vld [vmem:[#allocation11 + $0x70] sm:$0xff] }
 0x319   :  { %v4141_v49 = vpop.eup %4140  ;;  %3516 = vmatpush3.msra.mxu0 %v5085_v50  ;;  %v1034_v51 = vrot.slane %v4139_v40, 1  ;;  %v5123_v40 = vld [vmem:[#allocation11 + $0x68] sm:$0xff] }
 0x31a   :  { %v4143_v52 = vpop.eup %4142  ;;  %3517 = vmatprep.subr.mxu0 %v4996_v43  ;;  %v1037_v38 = vrot.slane %v4141_v49, 7 }
 0x31b   :  { %v4145_v53 = vpop.eup %4144  ;;  %3518 = vmatpush3.msra.mxu0 %v5089_v54  ;;  %v1035_v19 = vsel %vm487_vm1, %v1034_v51, %v1033_v48  ;;  %v1039_v17 = vrot.slane %v4143_v52, 6  ;;  %v5196_v48 = vld [vmem:[#allocation11 + $0x8] sm:$0xff] }
 0x31c   :  { %v4147_v42 = vpop.eup %4146  ;;  %3519 = vmatprep.subr.mxu0 %v4996_v43  ;;  %v1036_v27 = vsel %vm490_vm2, %v4135_v16, %v1035_v19  ;;  %v1041_v30 = vrot.slane %v4145_v53, 5  ;;  %v5111_v16 = vld [vmem:[#allocation11 + $0x78] sm:$0xff]  ;;  %5923 = vst [vmem:[#allocation21_spill] sm:$0xff] %v5196_v48 }
 0x31d   :  { %v4149_v13 = vpop.eup %4148  ;;  %3520 = vmatpush3.msra.mxu0 %v5095_v25  ;;  %v1038_v29 = vsel %vm493_vm3, %v1037_v38, %v1036_v27  ;;  %v1043_v32 = vrot.slane %v4147_v42, 4 }
 0x31e   :  { %3521 = vmatprep.subr.mxu0 %v4996_v43  ;;  %v1040_v31 = vsel %vm496_vm4, %v1039_v17, %v1038_v29  ;;  %v1045_v4 = vrot.slane %v4149_v13, 3 }
 0x31f   :  { %3522 = vmatpush3.msra.mxu0 %v5101_v23  ;;  %v1042_v18 = vsel %vm499_vm5, %v1041_v30, %v1040_v31 }
 0x320   :  { %3523 = vmatprep.subr.mxu0 %v4996_v43  ;;  %v1044_v33 = vsel %vm502_vm6, %v1043_v32, %v1042_v18 }
 0x321   :  { %3524 = vmatpush3.msra.mxu0 %v5107_v21  ;;  %v1046_v37 = vsel %vm505_vm7, %v1045_v4, %v1044_v33 }
 0x322   :  { %3491 = vmatmul.mubr.f32.vlgmr.msra.gmra.mxu1 %v1046_v37  ;;  %3526 = vmatmul.mubr.f32.vlgmr.msra.gmra.mxu0 %v1046_v37 }
 0x323   :  { %3529 = vmatpush3.msra.mxu1 %v5111_v16  ;;  %3563 = vmatprep.subr.mxu0 %v4996_v43 }
 0x324   :  { %3530 = vmatprep.subr.mxu1 %v4996_v43  ;;  %3564 = vmatpush3.msra.mxu0 %v4711_v57  ;;  %v5129_v57 = vld [vmem:[#allocation11 + $0x60] sm:$0xff] }
 0x325   :  { %3531 = vmatpush3.msra.mxu1 %v5117_v36  ;;  %3565 = vmatprep.subr.mxu0 %v4996_v43 }
 0x326   :  { %3532 = vmatprep.subr.mxu1 %v4996_v43  ;;  %3566 = vmatpush3.msra.mxu0 %v4719_v58  ;;  %v5135_v58 = vld [vmem:[#allocation11 + $0x58] sm:$0xff] }
 0x327   :  { %3533 = vmatpush3.msra.mxu1 %v5123_v40  ;;  %3567 = vmatprep.subr.mxu0 %v4996_v43 }
 0x328   :  { %3534 = vmatprep.subr.mxu1 %v4996_v43  ;;  %3568 = vmatpush3.msra.mxu0 %v4725_v59  ;;  %v5141_v59 = vld [vmem:[#allocation11 + $0x50] sm:$0xff] }
 0x329   :  { %3535 = vmatpush3.msra.mxu1 %v5129_v57  ;;  %3569 = vmatprep.subr.mxu0 %v4996_v43 }
 0x32a   :  { %3536 = vmatprep.subr.mxu1 %v4996_v43  ;;  %3570 = vmatpush3.msra.mxu0 %v4731_v60  ;;  %v5147_v60 = vld [vmem:[#allocation11 + $0x48] sm:$0xff] }
 0x32b   :  { %3537 = vmatpush3.msra.mxu1 %v5135_v58  ;;  %3571 = vmatprep.subr.mxu0 %v4996_v43 }
 0x32c   :  { %3538 = vmatprep.subr.mxu1 %v4996_v43  ;;  %3572 = vmatpush3.msra.mxu0 %v4737_v61  ;;  %v5153_v61 = vld [vmem:[#allocation11 + $0x40] sm:$0xff] }
 0x32d   :  { %3539 = vmatpush3.msra.mxu1 %v5141_v59  ;;  %3573 = vmatprep.subr.mxu0 %v4996_v43 }
 0x32e   :  { %3540 = vmatprep.subr.mxu1 %v4996_v43  ;;  %3574 = vmatpush3.msra.mxu0 %v4743_v62  ;;  %v5159_v62 = vld [vmem:[#allocation11 + $0x38] sm:$0xff] }
 0x32f   :  { %3541 = vmatpush3.msra.mxu1 %v5147_v60  ;;  %3575 = vmatprep.subr.mxu0 %v4996_v43 }
 0x330   :  { %3542 = vmatprep.subr.mxu1 %v4996_v43  ;;  %3576 = vmatpush3.msra.mxu0 %v4746_v63  ;;  %v5165_v63 = vld [vmem:[#allocation11 + $0x30] sm:$0xff] }
 0x331   :  { %3543 = vmatpush3.msra.mxu1 %v5153_v61  ;;  %3577 = vmatprep.subr.mxu0 %v4996_v43 }
 0x332   :  { %3544 = vmatprep.subr.mxu1 %v4996_v43  ;;  %3578 = vmatpush3.msra.mxu0 %v4752_v1  ;;  %v5171_v1 = vld [vmem:[#allocation11 + $0x28] sm:$0xff] }
 0x333   :  { %3545 = vmatpush3.msra.mxu1 %v5159_v62  ;;  %3579 = vmatprep.subr.mxu0 %v4996_v43 }
 0x334   :  { %3546 = vmatprep.subr.mxu1 %v4996_v43  ;;  %3580 = vmatpush3.msra.mxu0 %v4758_v3  ;;  %v5177_v3 = vld [vmem:[#allocation11 + $0x20] sm:$0xff] }
 0x335   :  { %3547 = vmatpush3.msra.mxu1 %v5165_v63  ;;  %3581 = vmatprep.subr.mxu0 %v4996_v43 }
 0x336   :  { %3548 = vmatprep.subr.mxu1 %v4996_v43  ;;  %3582 = vmatpush3.msra.mxu0 %v4764_v5  ;;  %v5184_v5 = vld [vmem:[#allocation11 + $0x18] sm:$0xff] }
 0x337   :  { %3549 = vmatpush3.msra.mxu1 %v5171_v1  ;;  %3583 = vmatprep.subr.mxu0 %v4996_v43 }
 0x338   :  { %3550 = vmatprep.subr.mxu1 %v4996_v43  ;;  %3584 = vmatpush3.msra.mxu0 %v4770_v7  ;;  %v5190_v7 = vld [vmem:[#allocation11 + $0x10] sm:$0xff] }
 0x339   :  { %3551 = vmatpush3.msra.mxu1 %v5177_v3  ;;  %3560 = vmatprep.mubr.msk.f32.mxu1 %vm4462_vm0, %v4996_v43 }
 0x33a   :  { %3552 = vmatprep.subr.mxu1 %v4996_v43  ;;  %3585 = vmatprep.subr.mxu0 %v4996_v43 }
 0x33b   :  { %3553 = vmatpush3.msra.mxu1 %v5184_v5  ;;  %3586 = vmatpush3.msra.mxu0 %v4776_v9  ;;  %v5202_v9 = vld [vmem:[#allocation11] sm:$0xff] }
 0x33c   :  { %3554 = vmatprep.subr.mxu1 %v4996_v43  ;;  %3587 = vmatprep.subr.mxu0 %v4996_v43  ;;  %5924 = vst [vmem:[#allocation22_spill] sm:$0xff] %v5202_v9 }
 0x33d   :  { %3555 = vmatpush3.msra.mxu1 %v5190_v7  ;;  %3588 = vmatpush3.msra.mxu0 %v4782_v11 }
 0x33e   :  { %3556 = vmatprep.subr.mxu1 %v4996_v43  ;;  %3589 = vmatprep.subr.mxu0 %v4996_v43 }
 0x33f   :  { %3557 = vmatpush3.msra.mxu1 %v5196_v48  ;;  %3590 = vmatpush3.msra.mxu0 %v5916_v44 }
 0x340   :  { %3558 = vmatprep.subr.mxu1 %v4996_v43  ;;  %3591 = vmatprep.subr.mxu0 %v4996_v43 }
 0x341   :  { %3559 = vmatpush3.msra.mxu1 %v5202_v9  ;;  %3592 = vmatpush3.msra.mxu0 %v5917_v46 }
 0x342   :  { %3598 = vmatprep.subr.mxu1 %v4996_v43  ;;  %3593 = vmatprep.subr.mxu0 %v4996_v43 }
 0x343   :  { %3594 = vmatpush3.msra.mxu0 %v5918_v47  ;;  %3595 = vmatprep.mubr.msk.f32.mxu0 %vm4462_vm0, %v4996_v43 }
 0x344   :  { %3633 = vmatprep.subr.mxu0 %v4996_v43 }
 0x3c2   :  { %v1021_v11 = vpop.f32.mrf.mxu0 }
 0x3c4   :  { %v3457_v44 = vpop.f32.mrf.mxu0 }
 0x3e2   :  { %v1114_v49 = vpop.f32.mrf.mxu1  ;;  %v1186_v51 = vpop.f32.mrf.mxu0 }
 0x3e3   :  { %v1115_v52 = vadd.f32 %v1114_v49, %v1021_v11  ;;  %v1191_v53 = vrot.slane %v1186_v51, 5  ;;  %v1192_v19 = vrot.slane %v1186_v51, 6  ;;  %v1193_v38 = vrot.slane %v1186_v51, 7 }
 0x3e4   :  { %v1194_v46 = vrot.slane %v1186_v51, 1  ;;  %v1209_v42 = vadd.f32 %v1186_v51, %v4814_v41  ;;  %v3492_v27 = vpop.f32.mrf.mxu1  ;;  %v3527_v17 = vpop.f32.mrf.mxu0  ;;  %v1195_v13 = vrot.slane %v1186_v51, 2  ;;  %v1196_v31 = vrot.slane %v1186_v51, 3 }
 0x3e5   :  { %v1118_v47 = vadd.f32 %v4908_v24, %v1115_v52  ;;  %v1206_v29 = vadd.f32 %v1191_v53, %v4812_v34  ;;  %v1207_v30 = vadd.f32 %v1192_v19, %v5921_v2  ;;  %v1208_v32 = vadd.f32 %v1193_v38, %v4817_v0 }
 0x3e6   :  { %4150 = vtanh.f32 %v1209_v42  ;;  %v1197_v18 = vrot.slane %v1186_v51, 4  ;;  %v1210_v4 = vadd.f32 %v1194_v46, %v4823_v26  ;;  %v1211_v33 = vadd.f32 %v1195_v13, %v4820_v28 }
 0x3e7   :  { %4152 = vtanh.f32 %v1118_v47  ;;  %v1212_v37 = vadd.f32 %v1196_v31, %v4829_v20 }
 0x3e8   :  { %4154 = vtanh.f32 %v1206_v29  ;;  %v1213_v11 = vadd.f32 %v1197_v18, %v4826_v45 }
 0x3e9   :  { %4156 = vtanh.f32 %v1207_v30 }
 0x3ea   :  { %4158 = vtanh.f32 %v1208_v32 }
 0x3eb   :  { %4160 = vtanh.f32 %v1210_v4 }
 0x3ec   :  { %4162 = vtanh.f32 %v1211_v33 }
 0x3ed   :  { %4164 = vtanh.f32 %v1212_v37 }
 0x3ee   :  { %4166 = vtanh.f32 %v1213_v11 }
 0x3f3   :  { %v4151_v44 = vpop.eup %4150 }
 0x3f4   :  { %v4153_v49 = vpop.eup %4152 }
 0x3f5   :  { %v4155_v52 = vpop.eup %4154  ;;  %3561 = vmatmul.mubr.f32.vlgmr.msra.gmra.mxu1 %v4153_v49 }
 0x3f6   :  { %v4157_v51 = vpop.eup %4156  ;;  %3599 = vmatpush3.msra.mxu1 %v5031_v55  ;;  %v1300_v53 = vrot.slane %v4155_v52, 3  ;;  %3630 = vmatprep.mubr.msk.f32.mxu1 %vm4462_vm0, %v4996_v43  ;;  %v5294_v52 = vld [vmem:[#allocation9 + $0x70] sm:$0xff] }
 0x3f7   :  { %v4159_v19 = vpop.eup %4158  ;;  %3600 = vmatprep.subr.mxu1 %v4996_v43  ;;  %v1301_v38 = vrot.slane %v4157_v51, 2  ;;  %v5300_v51 = vld [vmem:[#allocation9 + $0x68] sm:$0xff] }
 0x3f8   :  { %v4161_v46 = vpop.eup %4160  ;;  %3601 = vmatpush3.msra.mxu1 %v5037_v56  ;;  %v1303_v42 = vrot.slane %v4159_v19, 1  ;;  %v5312_v19 = vld [vmem:[#allocation9 + $0x58] sm:$0xff] }
 0x3f9   :  { %v4163_v27 = vpop.eup %4162  ;;  %3602 = vmatprep.subr.mxu1 %v4996_v43  ;;  %v1302_v17 = vsel %vm487_vm1, %v1301_v38, %v1300_v53  ;;  %v1306_v29 = vrot.slane %v4161_v46, 7  ;;  %v5306_v53 = vld [vmem:[#allocation9 + $0x60] sm:$0xff]  ;;  %v5318_v38 = vld [vmem:[#allocation9 + $0x50] sm:$0xff]  ;;  %v5322_v46 = vld [vmem:[#allocation9 + $0x48] sm:$0xff] }
 0x3fa   :  { %v4165_v13 = vpop.eup %4164  ;;  %3603 = vmatpush3.msra.mxu1 %v5042_v15  ;;  %v1304_v47 = vsel %vm490_vm2, %v1303_v42, %v1302_v17  ;;  %v1308_v32 = vrot.slane %v4163_v27, 6  ;;  %v5326_v42 = vld [vmem:[#allocation9 + $0x40] sm:$0xff]  ;;  %v5330_v27 = vld [vmem:[#allocation9 + $0x38] sm:$0xff]  ;;  %v5334_v17 = vld [vmem:[#allocation9 + $0x30] sm:$0xff] }
 0x3fb   :  { %v4167_v30 = vpop.eup %4166  ;;  %3604 = vmatprep.subr.mxu1 %v4996_v43  ;;  %v1305_v31 = vsel %vm493_vm3, %v4151_v44, %v1304_v47  ;;  %v1310_v4 = vrot.slane %v4165_v13, 5  ;;  %v5288_v44 = vld [vmem:[#allocation9 + $0x78] sm:$0xff]  ;;  %v5338_v13 = vld [vmem:[#allocation9 + $0x28] sm:$0xff]  ;;  %v5342_v47 = vld [vmem:[#allocation9 + $0x20] sm:$0xff] }
 0x3fc   :  { %3605 = vmatpush3.msra.mxu1 %v5049_v22  ;;  %v1307_v18 = vsel %vm496_vm4, %v1306_v29, %v1305_v31  ;;  %v1312_v37 = vrot.slane %v4167_v30, 4  ;;  %5925 = vst [vmem:[#allocation23_spill] sm:$0xff] %v5338_v13  ;;  %5926 = vst [vmem:[#allocation24_spill] sm:$0xff] %v5342_v47  ;;  %v5346_v29 = vld [vmem:[#allocation9 + $0x18] sm:$0xff]  ;;  %v5350_v30 = vld [vmem:[#allocation9 + $0x10] sm:$0xff] }
 0x3fd   :  { %3606 = vmatprep.subr.mxu1 %v4996_v43  ;;  %v1309_v33 = vsel %vm499_vm5, %v1308_v32, %v1307_v18  ;;  %5927 = vst [vmem:[#allocation25_spill] sm:$0xff] %v5346_v29  ;;  %5928 = vst [vmem:[#allocation26_spill] sm:$0xff] %v5350_v30  ;;  %v5354_v31 = vld [vmem:[#allocation9 + $0x8] sm:$0xff]  ;;  %v5358_v32 = vld [vmem:[#allocation9] sm:$0xff] }
 0x3fe   :  { %3607 = vmatpush3.msra.mxu1 %v5055_v35  ;;  %v1311_v11 = vsel %vm502_vm6, %v1310_v4, %v1309_v33  ;;  %5929 = vst [vmem:[#allocation27_spill] sm:$0xff] %v5354_v31  ;;  %5930 = vst [vmem:[#allocation28_spill] sm:$0xff] %v5358_v32 }
 0x3ff   :  { %v1313_v49 = vsel %vm505_vm7, %v1312_v37, %v1311_v11  ;;  %3608 = vmatprep.subr.mxu1 %v4996_v43 }
 0x400   :  { %3596 = vmatmul.mubr.f32.vlgmr.msra.gmra.mxu0 %v1313_v49  ;;  %3609 = vmatpush3.msra.mxu1 %v5061_v6 }
 0x401   :  { %3610 = vmatprep.subr.mxu1 %v4996_v43  ;;  %3634 = vmatpush3.msra.mxu0 %v5111_v16 }
 0x402   :  { %3611 = vmatpush3.msra.mxu1 %v5065_v8  ;;  %3635 = vmatprep.subr.mxu0 %v4996_v43 }
 0x403   :  { %3612 = vmatprep.subr.mxu1 %v4996_v43  ;;  %3636 = vmatpush3.msra.mxu0 %v5117_v36 }
 0x404   :  { %3613 = vmatpush3.msra.mxu1 %v5069_v10  ;;  %3637 = vmatprep.subr.mxu0 %v4996_v43 }
 0x405   :  { %3614 = vmatprep.subr.mxu1 %v4996_v43  ;;  %3638 = vmatpush3.msra.mxu0 %v5123_v40 }
 0x406   :  { %3615 = vmatpush3.msra.mxu1 %v5073_v12  ;;  %3639 = vmatprep.subr.mxu0 %v4996_v43 }
 0x407   :  { %3616 = vmatprep.subr.mxu1 %v4996_v43  ;;  %3640 = vmatpush3.msra.mxu0 %v5129_v57 }
 0x408   :  { %3617 = vmatpush3.msra.mxu1 %v5077_v14  ;;  %3641 = vmatprep.subr.mxu0 %v4996_v43 }
 0x409   :  { %3618 = vmatprep.subr.mxu1 %v4996_v43  ;;  %3642 = vmatpush3.msra.mxu0 %v5135_v58 }
 0x40a   :  { %3619 = vmatpush3.msra.mxu1 %v5081_v39  ;;  %3643 = vmatprep.subr.mxu0 %v4996_v43 }
 0x40b   :  { %3620 = vmatprep.subr.mxu1 %v4996_v43  ;;  %3644 = vmatpush3.msra.mxu0 %v5141_v59 }
 0x40c   :  { %3621 = vmatpush3.msra.mxu1 %v5085_v50  ;;  %3645 = vmatprep.subr.mxu0 %v4996_v43 }
 0x40d   :  { %3622 = vmatprep.subr.mxu1 %v4996_v43  ;;  %3646 = vmatpush3.msra.mxu0 %v5147_v60 }
 0x40e   :  { %3623 = vmatpush3.msra.mxu1 %v5089_v54  ;;  %3647 = vmatprep.subr.mxu0 %v4996_v43 }
 0x40f   :  { %3624 = vmatprep.subr.mxu1 %v4996_v43  ;;  %3648 = vmatpush3.msra.mxu0 %v5153_v61 }
 0x410   :  { %3625 = vmatpush3.msra.mxu1 %v5095_v25  ;;  %3649 = vmatprep.subr.mxu0 %v4996_v43 }
 0x411   :  { %3626 = vmatprep.subr.mxu1 %v4996_v43  ;;  %3650 = vmatpush3.msra.mxu0 %v5159_v62 }
 0x412   :  { %3627 = vmatpush3.msra.mxu1 %v5101_v23  ;;  %3651 = vmatprep.subr.mxu0 %v4996_v43 }
 0x413   :  { %3628 = vmatprep.subr.mxu1 %v4996_v43  ;;  %3652 = vmatpush3.msra.mxu0 %v5165_v63 }
 0x414   :  { %3629 = vmatpush3.msra.mxu1 %v5107_v21  ;;  %3653 = vmatprep.subr.mxu0 %v4996_v43 }
 0x415   :  { %3631 = vmatmul.mubr.f32.vlgmr.msra.gmra.mxu1 %v1313_v49  ;;  %3654 = vmatpush3.msra.mxu0 %v5171_v1 }
 0x416   :  { %3655 = vmatprep.subr.mxu0 %v4996_v43  ;;  %3665 = vmatprep.mubr.msk.f32.mxu0 %vm4462_vm0, %v4996_v43 }
 0x417   :  { %3656 = vmatpush3.msra.mxu0 %v5177_v3  ;;  %3668 = vmatprep.subr.mxu1 %v4996_v43 }
 0x418   :  { %3657 = vmatprep.subr.mxu0 %v4996_v43  ;;  %3669 = vmatpush3.msra.mxu1 %v5288_v44 }
 0x419   :  { %3658 = vmatpush3.msra.mxu0 %v5184_v5  ;;  %3670 = vmatprep.subr.mxu1 %v4996_v43 }
 0x41a   :  { %3659 = vmatprep.subr.mxu0 %v4996_v43  ;;  %3671 = vmatpush3.msra.mxu1 %v5294_v52 }
 0x41b   :  { %3660 = vmatpush3.msra.mxu0 %v5190_v7  ;;  %3672 = vmatprep.subr.mxu1 %v4996_v43 }
 0x41c   :  { %3661 = vmatprep.subr.mxu0 %v4996_v43  ;;  %3673 = vmatpush3.msra.mxu1 %v5300_v51 }
 0x41d   :  { %3662 = vmatpush3.msra.mxu0 %v5196_v48  ;;  %3674 = vmatprep.subr.mxu1 %v4996_v43 }
 0x41e   :  { %3663 = vmatprep.subr.mxu0 %v4996_v43  ;;  %3675 = vmatpush3.msra.mxu1 %v5306_v53 }
 0x41f   :  { %3664 = vmatpush3.msra.mxu0 %v5202_v9  ;;  %3676 = vmatprep.subr.mxu1 %v4996_v43 }
 0x420   :  { %3703 = vmatprep.subr.mxu0 %v4996_v43  ;;  %3677 = vmatpush3.msra.mxu1 %v5312_v19 }
 0x421   :  { %3678 = vmatprep.subr.mxu1 %v4996_v43  ;;  %3700 = vmatprep.mubr.msk.f32.mxu1 %vm4462_vm0, %v4996_v43 }
 0x422   :  { %3679 = vmatpush3.msra.mxu1 %v5318_v38 }
 0x423   :  { %3680 = vmatprep.subr.mxu1 %v4996_v43 }
 0x424   :  { %3681 = vmatpush3.msra.mxu1 %v5322_v46 }
 0x425   :  { %3682 = vmatprep.subr.mxu1 %v4996_v43 }
 0x426   :  { %3683 = vmatpush3.msra.mxu1 %v5326_v42 }
 0x427   :  { %3684 = vmatprep.subr.mxu1 %v4996_v43 }
 0x428   :  { %3685 = vmatpush3.msra.mxu1 %v5330_v27 }
 0x429   :  { %3686 = vmatprep.subr.mxu1 %v4996_v43 }
 0x42a   :  { %3687 = vmatpush3.msra.mxu1 %v5334_v17 }
 0x42b   :  { %3688 = vmatprep.subr.mxu1 %v4996_v43 }
 0x42c   :  { %3689 = vmatpush3.msra.mxu1 %v5338_v13 }
 0x42d   :  { %3690 = vmatprep.subr.mxu1 %v4996_v43 }
 0x42e   :  { %3691 = vmatpush3.msra.mxu1 %v5342_v47 }
 0x42f   :  { %3692 = vmatprep.subr.mxu1 %v4996_v43 }
 0x430   :  { %3693 = vmatpush3.msra.mxu1 %v5346_v29 }
 0x431   :  { %3694 = vmatprep.subr.mxu1 %v4996_v43 }
 0x432   :  { %3695 = vmatpush3.msra.mxu1 %v5350_v30 }
 0x433   :  { %3696 = vmatprep.subr.mxu1 %v4996_v43 }
 0x434   :  { %3697 = vmatpush3.msra.mxu1 %v5354_v31 }
 0x435   :  { %3698 = vmatprep.subr.mxu1 %v4996_v43 }
 0x436   :  { %3699 = vmatpush3.msra.mxu1 %v5358_v32 }
 0x437   :  { %3738 = vmatprep.subr.mxu1 %v4996_v43 }
 0x4b5   :  { %v1288_v18 = vpop.f32.mrf.mxu1 }
 0x4b7   :  { %v3562_v4 = vpop.f32.mrf.mxu1 }
 0x4c0   :  { %v1381_v33 = vpop.f32.mrf.mxu0 }
 0x4c1   :  { %v1382_v37 = vadd.f32 %v1381_v33, %v1288_v18 }
 0x4c2   :  { %v3597_v11 = vpop.f32.mrf.mxu0 }
 0x4c3   :  { %v1385_v49 = vadd.f32 %v4908_v24, %v1382_v37 }
 0x4c5   :  { %4168 = vtanh.f32 %v1385_v49 }
 0x4d2   :  { %v4169_v9 = vpop.eup %4168 }
 0x4d3   :  { %3666 = vmatmul.mubr.f32.vlgmr.msra.gmra.mxu0 %v4169_v9 }
 0x4d4   :  { %3704 = vmatpush3.msra.mxu0 %v5031_v55  ;;  %3735 = vmatprep.mubr.msk.f32.mxu0 %vm4462_vm0, %v4996_v43 }
 0x4d5   :  { %3705 = vmatprep.subr.mxu0 %v4996_v43  ;;  %v1453_v32 = vpop.f32.mrf.mxu1 }
 0x4d6   :  { %3706 = vmatpush3.msra.mxu0 %v5037_v56  ;;  %v1458_v31 = vrot.slane %v1453_v32, 4  ;;  %v1459_v4 = vrot.slane %v1453_v32, 5  ;;  %v1460_v30 = vrot.slane %v1453_v32, 6  ;;  %v1461_v18 = vrot.slane %v1453_v32, 7 }
 0x4d7   :  { %v1477_v33 = vadd.f32 %v1453_v32, %v4823_v26  ;;  %3707 = vmatprep.subr.mxu0 %v4996_v43  ;;  %v3632_v24 = vpop.f32.mrf.mxu1  ;;  %v1462_v9 = vrot.slane %v1453_v32, 1  ;;  %v1463_v37 = vrot.slane %v1453_v32, 2  ;;  %v1464_v56 = vrot.slane %v1453_v32, 3 }
 0x4d8   :  { %v1473_v11 = vadd.f32 %v1458_v31, %v4812_v34  ;;  %v1474_v49 = vadd.f32 %v1459_v4, %v5921_v2  ;;  %v1475_v55 = vadd.f32 %v1460_v30, %v4817_v0  ;;  %3708 = vmatpush3.msra.mxu0 %v5042_v15  ;;  %v1476_v48 = vadd.f32 %v1461_v18, %v4814_v41 }
 0x4d9   :  { %4170 = vtanh.f32 %v1477_v33  ;;  %3709 = vmatprep.subr.mxu0 %v4996_v43  ;;  %v1478_v24 = vadd.f32 %v1462_v9, %v4820_v28  ;;  %v1479_v31 = vadd.f32 %v1463_v37, %v4829_v20  ;;  %v1480_v30 = vadd.f32 %v1464_v56, %v4826_v45 }
 0x4da   :  { %4172 = vtanh.f32 %v1473_v11  ;;  %3710 = vmatpush3.msra.mxu0 %v5049_v22 }
 0x4db   :  { %4174 = vtanh.f32 %v1474_v49  ;;  %3711 = vmatprep.subr.mxu0 %v4996_v43 }
 0x4dc   :  { %4176 = vtanh.f32 %v1475_v55  ;;  %3712 = vmatpush3.msra.mxu0 %v5055_v35 }
 0x4dd   :  { %3713 = vmatprep.subr.mxu0 %v4996_v43  ;;  %4178 = vtanh.f32 %v1476_v48 }
 0x4de   :  { %3714 = vmatpush3.msra.mxu0 %v5061_v6  ;;  %4180 = vtanh.f32 %v1478_v24 }
 0x4df   :  { %3715 = vmatprep.subr.mxu0 %v4996_v43  ;;  %4182 = vtanh.f32 %v1479_v31 }
 0x4e0   :  { %3716 = vmatpush3.msra.mxu0 %v5065_v8  ;;  %4184 = vtanh.f32 %v1480_v30 }
 0x4e1   :  { %3717 = vmatprep.subr.mxu0 %v4996_v43 }
 0x4e2   :  { %3718 = vmatpush3.msra.mxu0 %v5069_v10 }
 0x4e3   :  { %3719 = vmatprep.subr.mxu0 %v4996_v43 }
 0x4e4   :  { %3720 = vmatpush3.msra.mxu0 %v5073_v12 }
 0x4e5   :  { %3721 = vmatprep.subr.mxu0 %v4996_v43 }
 0x4e6   :  { %v4171_v55 = vpop.eup %4170  ;;  %3722 = vmatpush3.msra.mxu0 %v5077_v14 }
 0x4e7   :  { %v4173_v56 = vpop.eup %4172  ;;  %3723 = vmatprep.subr.mxu0 %v4996_v43 }
 0x4e8   :  { %v4175_v48 = vpop.eup %4174  ;;  %3724 = vmatpush3.msra.mxu0 %v5081_v39  ;;  %v1567_v32 = vrot.slane %v4173_v56, 4 }
 0x4e9   :  { %v4177_v4 = vpop.eup %4176  ;;  %3725 = vmatprep.subr.mxu0 %v4996_v43  ;;  %v1568_v18 = vrot.slane %v4175_v48, 3 }
 0x4ea   :  { %v4179_v33 = vpop.eup %4178  ;;  %3726 = vmatpush3.msra.mxu0 %v5085_v50  ;;  %v1570_v9 = vrot.slane %v4177_v4, 2 }
 0x4eb   :  { %v4181_v37 = vpop.eup %4180  ;;  %3727 = vmatprep.subr.mxu0 %v4996_v43  ;;  %v1569_v11 = vsel %vm487_vm1, %v1568_v18, %v1567_v32  ;;  %v1572_v49 = vrot.slane %v4179_v33, 1 }
 0x4ec   :  { %v4183_v24 = vpop.eup %4182  ;;  %3728 = vmatpush3.msra.mxu0 %v5089_v54  ;;  %v1571_v31 = vsel %vm490_vm2, %v1570_v9, %v1569_v11  ;;  %v1575_v48 = vrot.slane %v4181_v37, 7  ;;  %v5933_v37 = vld [vmem:[#allocation22_spill] sm:$0xff]  ;;  %v5934_v11 = vld [vmem:[#allocation27_spill] sm:$0xff] }
 0x4ed   :  { %v4185_v30 = vpop.eup %4184  ;;  %3729 = vmatprep.subr.mxu0 %v4996_v43  ;;  %v1573_v56 = vsel %vm493_vm3, %v1572_v49, %v1571_v31  ;;  %v1577_v50 = vrot.slane %v4183_v24, 6  ;;  %v5935_v49 = vld [vmem:[#allocation28_spill] sm:$0xff] }
 0x4ee   :  { %3730 = vmatpush3.msra.mxu0 %v5095_v25  ;;  %v1574_v4 = vsel %vm496_vm4, %v4171_v55, %v1573_v56  ;;  %v1579_v18 = vrot.slane %v4185_v30, 5  ;;  %v5932_v55 = vld [vmem:[#allocation26_spill] sm:$0xff] }
 0x4ef   :  { %3731 = vmatprep.subr.mxu0 %v4996_v43  ;;  %v1576_v32 = vsel %vm499_vm5, %v1575_v48, %v1574_v4 }
 0x4f0   :  { %3732 = vmatpush3.msra.mxu0 %v5101_v23  ;;  %v1578_v33 = vsel %vm502_vm6, %v1577_v50, %v1576_v32  ;;  %v5931_v50 = vld [vmem:[#allocation21_spill] sm:$0xff] }
 0x4f1   :  { %3733 = vmatprep.subr.mxu0 %v4996_v43  ;;  %v1580_v9 = vsel %vm505_vm7, %v1579_v18, %v1578_v33 }
 0x4f2   :  { %3734 = vmatpush3.msra.mxu0 %v5107_v21  ;;  %3701 = vmatmul.mubr.f32.vlgmr.msra.gmra.mxu1 %v1580_v9 }
 0x4f3   :  { %3736 = vmatmul.mubr.f32.vlgmr.msra.gmra.mxu0 %v1580_v9  ;;  %3739 = vmatpush3.msra.mxu1 %v5111_v16 }
 0x4f4   :  { %3740 = vmatprep.subr.mxu1 %v4996_v43  ;;  %3773 = vmatprep.subr.mxu0 %v4996_v43 }
 0x4f5   :  { %3741 = vmatpush3.msra.mxu1 %v5117_v36  ;;  %3774 = vmatpush3.msra.mxu0 %v5288_v44 }
 0x4f6   :  { %3742 = vmatprep.subr.mxu1 %v4996_v43  ;;  %3775 = vmatprep.subr.mxu0 %v4996_v43 }
 0x4f7   :  { %3743 = vmatpush3.msra.mxu1 %v5123_v40  ;;  %3776 = vmatpush3.msra.mxu0 %v5294_v52 }
 0x4f8   :  { %3744 = vmatprep.subr.mxu1 %v4996_v43  ;;  %3777 = vmatprep.subr.mxu0 %v4996_v43 }
 0x4f9   :  { %3745 = vmatpush3.msra.mxu1 %v5129_v57  ;;  %3778 = vmatpush3.msra.mxu0 %v5300_v51 }
 0x4fa   :  { %3746 = vmatprep.subr.mxu1 %v4996_v43  ;;  %3779 = vmatprep.subr.mxu0 %v4996_v43 }
 0x4fb   :  { %3747 = vmatpush3.msra.mxu1 %v5135_v58  ;;  %3780 = vmatpush3.msra.mxu0 %v5306_v53 }
 0x4fc   :  { %3748 = vmatprep.subr.mxu1 %v4996_v43  ;;  %3781 = vmatprep.subr.mxu0 %v4996_v43 }
 0x4fd   :  { %3749 = vmatpush3.msra.mxu1 %v5141_v59  ;;  %3782 = vmatpush3.msra.mxu0 %v5312_v19 }
 0x4fe   :  { %3750 = vmatprep.subr.mxu1 %v4996_v43  ;;  %3783 = vmatprep.subr.mxu0 %v4996_v43 }
 0x4ff   :  { %3751 = vmatpush3.msra.mxu1 %v5147_v60  ;;  %3784 = vmatpush3.msra.mxu0 %v5318_v38 }
 0x500   :  { %3752 = vmatprep.subr.mxu1 %v4996_v43  ;;  %3785 = vmatprep.subr.mxu0 %v4996_v43 }
 0x501   :  { %3753 = vmatpush3.msra.mxu1 %v5153_v61  ;;  %3786 = vmatpush3.msra.mxu0 %v5322_v46 }
 0x502   :  { %3754 = vmatprep.subr.mxu1 %v4996_v43  ;;  %3787 = vmatprep.subr.mxu0 %v4996_v43 }
 0x503   :  { %3755 = vmatpush3.msra.mxu1 %v5159_v62  ;;  %3788 = vmatpush3.msra.mxu0 %v5326_v42 }
 0x504   :  { %3756 = vmatprep.subr.mxu1 %v4996_v43  ;;  %3789 = vmatprep.subr.mxu0 %v4996_v43 }
 0x505   :  { %3757 = vmatpush3.msra.mxu1 %v5165_v63  ;;  %3790 = vmatpush3.msra.mxu0 %v5330_v27 }
 0x506   :  { %3758 = vmatprep.subr.mxu1 %v4996_v43  ;;  %3791 = vmatprep.subr.mxu0 %v4996_v43 }
 0x507   :  { %3759 = vmatpush3.msra.mxu1 %v5171_v1  ;;  %3792 = vmatpush3.msra.mxu0 %v5334_v17 }
 0x508   :  { %3760 = vmatprep.subr.mxu1 %v4996_v43  ;;  %3793 = vmatprep.subr.mxu0 %v4996_v43 }
 0x509   :  { %3761 = vmatpush3.msra.mxu1 %v5177_v3  ;;  %3794 = vmatpush3.msra.mxu0 %v5338_v13 }
 0x50a   :  { %3762 = vmatprep.subr.mxu1 %v4996_v43  ;;  %3770 = vmatprep.mubr.msk.f32.mxu1 %vm4462_vm0, %v4996_v43 }
 0x50b   :  { %3763 = vmatpush3.msra.mxu1 %v5184_v5  ;;  %3795 = vmatprep.subr.mxu0 %v4996_v43 }
 0x50c   :  { %3764 = vmatprep.subr.mxu1 %v4996_v43  ;;  %3796 = vmatpush3.msra.mxu0 %v5342_v47 }
 0x50d   :  { %3765 = vmatpush3.msra.mxu1 %v5190_v7  ;;  %3797 = vmatprep.subr.mxu0 %v4996_v43 }
 0x50e   :  { %3766 = vmatprep.subr.mxu1 %v4996_v43  ;;  %3798 = vmatpush3.msra.mxu0 %v5346_v29 }
 0x50f   :  { %3767 = vmatpush3.msra.mxu1 %v5931_v50  ;;  %3799 = vmatprep.subr.mxu0 %v4996_v43 }
 0x510   :  { %3768 = vmatprep.subr.mxu1 %v4996_v43  ;;  %3800 = vmatpush3.msra.mxu0 %v5932_v55 }
 0x511   :  { %3769 = vmatpush3.msra.mxu1 %v5933_v37  ;;  %3801 = vmatprep.subr.mxu0 %v4996_v43 }
 0x512   :  { %3808 = vmatprep.subr.mxu1 %v4996_v43  ;;  %3802 = vmatpush3.msra.mxu0 %v5934_v11  ;;  %v5480_v11 = vld [vmem:[#allocation12] ss:$0 sm:$0xff] }
 0x513   :  { %3803 = vmatprep.subr.mxu0 %v4996_v43  ;;  %3805 = vmatprep.mubr.msk.f32.mxu0 %vm4462_vm0, %v4996_v43 }
 0x514   :  { %3804 = vmatpush3.msra.mxu0 %v5935_v49 }
 0x515   :  { %3843 = vmatprep.subr.mxu0 %v4996_v43 }
 0x593   :  { %v1555_v24 = vpop.f32.mrf.mxu0 }
 0x595   :  { %v3667_v31 = vpop.f32.mrf.mxu0 }
 0x5b2   :  { %v1648_v30 = vpop.f32.mrf.mxu1 }
 0x5b3   :  { %v1649_v56 = vadd.f32 %v1648_v30, %v1555_v24  ;;  %v1720_v48 = vpop.f32.mrf.mxu0 }
 0x5b4   :  { %v1725_v4 = vrot.slane %v1720_v48, 3  ;;  %v1726_v32 = vrot.slane %v1720_v48, 4  ;;  %v1727_v18 = vrot.slane %v1720_v48, 5  ;;  %v1728_v33 = vrot.slane %v1720_v48, 6  ;;  %v3702_v9 = vpop.f32.mrf.mxu1 }
 0x5b5   :  { %v1652_v55 = vadd.f32 %v5480_v11, %v1649_v56  ;;  %v1729_v29 = vrot.slane %v1720_v48, 7  ;;  %v3737_v47 = vpop.f32.mrf.mxu0  ;;  %v1730_v13 = vrot.slane %v1720_v48, 1  ;;  %v1731_v24 = vrot.slane %v1720_v48, 2 }
 0x5b6   :  { %v1740_v49 = vadd.f32 %v1725_v4, %v4812_v34  ;;  %v1741_v43 = vadd.f32 %v1726_v32, %v5921_v2  ;;  %v1742_v31 = vadd.f32 %v1727_v18, %v4817_v0  ;;  %v1743_v30 = vadd.f32 %v1728_v33, %v4814_v41  ;;  %v5936_v18 = vld [vmem:[#allocation18_spill] sm:$0xff] }
 0x5b7   :  { %4186 = vtanh.f32 %v1652_v55  ;;  %v1744_v9 = vadd.f32 %v1729_v29, %v4823_v26  ;;  %v1746_v56 = vadd.f32 %v1730_v13, %v4829_v20  ;;  %v1747_v47 = vadd.f32 %v1731_v24, %v4826_v45  ;;  %v5492_v29 = vld [vmem:[#allocation2] sm:$0xff] }
 0x5b8   :  { %4188 = vtanh.f32 %v1740_v49  ;;  %v1745_v4 = vadd.f32 %v1720_v48, %v4820_v28 }
 0x5b9   :  { %4190 = vtanh.f32 %v1741_v43  ;;  %v5937_v43 = vld [vmem:[#allocation19_spill] sm:$0xff] }
 0x5ba   :  { %4192 = vtanh.f32 %v1742_v31 }
 0x5bb   :  { %4194 = vtanh.f32 %v1743_v30 }
 0x5bc   :  { %4196 = vtanh.f32 %v1744_v9 }
 0x5bd   :  { %4198 = vtanh.f32 %v1746_v56 }
 0x5be   :  { %4200 = vtanh.f32 %v1747_v47 }
 0x5bf   :  { %4202 = vtanh.f32 %v1745_v4 }
 0x5c4   :  { %v4187_v55 = vpop.eup %4186 }
 0x5c5   :  { %v4189_v32 = vpop.eup %4188  ;;  %3771 = vmatmul.mubr.f32.vlgmr.msra.gmra.mxu1 %v4187_v55 }
 0x5c6   :  { %v4191_v49 = vpop.eup %4190  ;;  %3809 = vmatpush3.msra.mxu1 %v5936_v18  ;;  %v1834_v33 = vrot.slane %v4189_v32, 5  ;;  %3840 = vmatprep.mubr.msk.f32.mxu1 %vm4462_vm0, %v5492_v29 }
 0x5c7   :  { %v4193_v13 = vpop.eup %4192  ;;  %3810 = vmatprep.subr.mxu1 %v5492_v29  ;;  %v1835_v48 = vrot.slane %v4191_v49, 4 }
 0x5c8   :  { %3811 = vmatpush3.msra.mxu1 %v5937_v43  ;;  %v1837_v31 = vrot.slane %v4193_v13, 3  ;;  %v4195_v24 = vpop.eup %4194 }
 0x5c9   :  { %3812 = vmatprep.subr.mxu1 %v5492_v29  ;;  %v1836_v30 = vsel %vm487_vm1, %v1835_v48, %v1834_v33  ;;  %v4197_v9 = vpop.eup %4196  ;;  %v1839_v47 = vrot.slane %v4195_v24, 2  ;;  %v4295_v24 = vld [vmem:[#allocation8 + $0x68] sm:$0xff] }
 0x5ca   :  { %3813 = vmatpush3.msra.mxu1 %v5042_v15  ;;  %v1838_v56 = vsel %vm490_vm2, %v1837_v31, %v1836_v30  ;;  %v4199_v4 = vpop.eup %4198  ;;  %v1841_v55 = vrot.slane %v4197_v9, 1 }
 0x5cb   :  { %3814 = vmatprep.subr.mxu1 %v5492_v29  ;;  %v4201_v32 = vpop.eup %4200  ;;  %v1840_v49 = vsel %vm493_vm3, %v1839_v47, %v1838_v56  ;;  %v1844_v13 = vrot.slane %v4199_v4, 7  ;;  %v4296_v56 = vld [vmem:[#allocation8 + $0x60] sm:$0xff] }
 0x5cc   :  { %3815 = vmatpush3.msra.mxu1 %v5049_v22  ;;  %v4203_v18 = vpop.eup %4202  ;;  %v1842_v33 = vsel %vm496_vm4, %v1841_v55, %v1840_v49  ;;  %v1846_v48 = vrot.slane %v4201_v32, 6  ;;  %v5938_v22 = vld [vmem:[#allocation20_spill] sm:$0xff] }
 0x5cd   :  { %3816 = vmatprep.subr.mxu1 %v5492_v29  ;;  %v1843_v15 = vsel %vm499_vm5, %v4203_v18, %v1842_v33  ;;  %v4297_v55 = vld [vmem:[#allocation8 + $0x58] sm:$0xff]  ;;  %v4298_v49 = vld [vmem:[#allocation8 + $0x50] sm:$0xff]  ;;  %v4299_v18 = vld [vmem:[#allocation8 + $0x48] sm:$0xff] }
 0x5ce   :  { %3817 = vmatpush3.msra.mxu1 %v5055_v35  ;;  %v1845_v43 = vsel %vm502_vm6, %v1844_v13, %v1843_v15  ;;  %v5939_v35 = vld [vmem:[#allocation23_spill] sm:$0xff]  ;;  %v4300_v33 = vld [vmem:[#allocation8 + $0x40] sm:$0xff]  ;;  %v4301_v13 = vld [vmem:[#allocation8 + $0x38] sm:$0xff] }
 0x5cf   :  { %3818 = vmatprep.subr.mxu1 %v5492_v29  ;;  %v1847_v31 = vsel %vm505_vm7, %v1846_v48, %v1845_v43  ;;  %v4302_v48 = vld [vmem:[#allocation8 + $0x30] sm:$0xff] }
 0x5d0   :  { %3819 = vmatpush3.msra.mxu1 %v5061_v6  ;;  %3806 = vmatmul.mubr.f32.vlgmr.msra.gmra.mxu0 %v1847_v31  ;;  %v5940_v6 = vld [vmem:[#allocation24_spill] sm:$0xff] }
 0x5d1   :  { %3820 = vmatprep.subr.mxu1 %v5492_v29  ;;  %3844 = vmatpush3.msra.mxu0 %v5111_v16 }
 0x5d2   :  { %3821 = vmatpush3.msra.mxu1 %v5065_v8  ;;  %3845 = vmatprep.subr.mxu0 %v5492_v29  ;;  %v5941_v8 = vld [vmem:[#allocation25_spill] sm:$0xff] }
 0x5d3   :  { %3822 = vmatprep.subr.mxu1 %v5492_v29  ;;  %3846 = vmatpush3.msra.mxu0 %v5117_v36 }
 0x5d4   :  { %3823 = vmatpush3.msra.mxu1 %v5069_v10  ;;  %3847 = vmatprep.subr.mxu0 %v5492_v29  ;;  %v5942_v10 = vld [vmem:[#allocation26_spill] sm:$0xff] }
 0x5d5   :  { %3824 = vmatprep.subr.mxu1 %v5492_v29  ;;  %3848 = vmatpush3.msra.mxu0 %v5123_v40  ;;  %v4293_v40 = vld [vmem:[#allocation8 + $0x78] sm:$0xff] }
 0x5d6   :  { %3825 = vmatpush3.msra.mxu1 %v5073_v12  ;;  %3849 = vmatprep.subr.mxu0 %v5492_v29  ;;  %v5943_v12 = vld [vmem:[#allocation27_spill] sm:$0xff] }
 0x5d7   :  { %3826 = vmatprep.subr.mxu1 %v5492_v29  ;;  %3850 = vmatpush3.msra.mxu0 %v5129_v57 }
 0x5d8   :  { %3827 = vmatpush3.msra.mxu1 %v5077_v14  ;;  %3851 = vmatprep.subr.mxu0 %v5492_v29  ;;  %v5944_v14 = vld [vmem:[#allocation28_spill] sm:$0xff] }
 0x5d9   :  { %3828 = vmatprep.subr.mxu1 %v5492_v29  ;;  %3852 = vmatpush3.msra.mxu0 %v5135_v58 }
 0x5da   :  { %3829 = vmatpush3.msra.mxu1 %v5081_v39  ;;  %3853 = vmatprep.subr.mxu0 %v5492_v29 }
 0x5db   :  { %3830 = vmatprep.subr.mxu1 %v5492_v29  ;;  %3854 = vmatpush3.msra.mxu0 %v5141_v59 }
 0x5dc   :  { %3831 = vmatpush3.msra.mxu1 %v5938_v22  ;;  %3855 = vmatprep.subr.mxu0 %v5492_v29 }
 0x5dd   :  { %3832 = vmatprep.subr.mxu1 %v5492_v29  ;;  %3856 = vmatpush3.msra.mxu0 %v5147_v60 }
 0x5de   :  { %3833 = vmatpush3.msra.mxu1 %v5089_v54  ;;  %3857 = vmatprep.subr.mxu0 %v5492_v29 }
 0x5df   :  { %3834 = vmatprep.subr.mxu1 %v5492_v29  ;;  %3858 = vmatpush3.msra.mxu0 %v5153_v61 }
 0x5e0   :  { %3835 = vmatpush3.msra.mxu1 %v5095_v25  ;;  %3859 = vmatprep.subr.mxu0 %v5492_v29 }
 0x5e1   :  { %3836 = vmatprep.subr.mxu1 %v5492_v29  ;;  %3860 = vmatpush3.msra.mxu0 %v5159_v62  ;;  %v4294_v62 = vld [vmem:[#allocation8 + $0x70] sm:$0xff] }
 0x5e2   :  { %3837 = vmatpush3.msra.mxu1 %v5101_v23  ;;  %3861 = vmatprep.subr.mxu0 %v5492_v29 }
 0x5e3   :  { %3838 = vmatprep.subr.mxu1 %v5492_v29  ;;  %3862 = vmatpush3.msra.mxu0 %v5165_v63 }
 0x5e4   :  { %3839 = vmatpush3.msra.mxu1 %v5107_v21  ;;  %3863 = vmatprep.subr.mxu0 %v5492_v29 }
 0x5e5   :  { %3841 = vmatmul.mubr.f32.vlgmr.msra.gmra.mxu1 %v1847_v31  ;;  %3864 = vmatpush3.msra.mxu0 %v5171_v1 }
 0x5e6   :  { %3875 = vmatprep.mubr.msk.f32.mxu0 %vm4462_vm0, %v5492_v29  ;;  %3865 = vmatprep.subr.mxu0 %v5492_v29 }
 0x5e7   :  { %3878 = vmatprep.subr.mxu1 %v5492_v29  ;;  %3866 = vmatpush3.msra.mxu0 %v5177_v3 }
 0x5e8   :  { %3879 = vmatpush3.msra.mxu1 %v5288_v44  ;;  %3867 = vmatprep.subr.mxu0 %v5492_v29 }
 0x5e9   :  { %3880 = vmatprep.subr.mxu1 %v5492_v29  ;;  %3868 = vmatpush3.msra.mxu0 %v5184_v5 }
 0x5ea   :  { %3881 = vmatpush3.msra.mxu1 %v5294_v52  ;;  %3869 = vmatprep.subr.mxu0 %v5492_v29 }
 0x5eb   :  { %3882 = vmatprep.subr.mxu1 %v5492_v29  ;;  %3870 = vmatpush3.msra.mxu0 %v5190_v7 }
 0x5ec   :  { %3883 = vmatpush3.msra.mxu1 %v5300_v51  ;;  %3871 = vmatprep.subr.mxu0 %v5492_v29 }
 0x5ed   :  { %3884 = vmatprep.subr.mxu1 %v5492_v29  ;;  %3872 = vmatpush3.msra.mxu0 %v5931_v50 }
 0x5ee   :  { %3885 = vmatpush3.msra.mxu1 %v5306_v53  ;;  %3873 = vmatprep.subr.mxu0 %v5492_v29 }
 0x5ef   :  { %3886 = vmatprep.subr.mxu1 %v5492_v29  ;;  %3874 = vmatpush3.msra.mxu0 %v5933_v37 }
 0x5f0   :  { %3887 = vmatpush3.msra.mxu1 %v5312_v19  ;;  %3913 = vmatprep.subr.mxu0 %v5492_v29 }
 0x5f1   :  { %3888 = vmatprep.subr.mxu1 %v5492_v29  ;;  %3910 = vmatprep.mubr.msk.f32.mxu1 %vm4462_vm0, %v5492_v29 }
 0x5f2   :  { %3889 = vmatpush3.msra.mxu1 %v5318_v38 }
 0x5f3   :  { %3890 = vmatprep.subr.mxu1 %v5492_v29 }
 0x5f4   :  { %3891 = vmatpush3.msra.mxu1 %v5322_v46 }
 0x5f5   :  { %3892 = vmatprep.subr.mxu1 %v5492_v29 }
 0x5f6   :  { %3893 = vmatpush3.msra.mxu1 %v5326_v42 }
 0x5f7   :  { %3894 = vmatprep.subr.mxu1 %v5492_v29 }
 0x5f8   :  { %3895 = vmatpush3.msra.mxu1 %v5330_v27 }
 0x5f9   :  { %3896 = vmatprep.subr.mxu1 %v5492_v29 }
 0x5fa   :  { %3897 = vmatpush3.msra.mxu1 %v5334_v17 }
 0x5fb   :  { %3898 = vmatprep.subr.mxu1 %v5492_v29 }
 0x5fc   :  { %3899 = vmatpush3.msra.mxu1 %v5939_v35 }
 0x5fd   :  { %3900 = vmatprep.subr.mxu1 %v5492_v29 }
 0x5fe   :  { %3901 = vmatpush3.msra.mxu1 %v5940_v6 }
 0x5ff   :  { %3902 = vmatprep.subr.mxu1 %v5492_v29 }
 0x600   :  { %3903 = vmatpush3.msra.mxu1 %v5941_v8 }
 0x601   :  { %3904 = vmatprep.subr.mxu1 %v5492_v29 }
 0x602   :  { %3905 = vmatpush3.msra.mxu1 %v5942_v10 }
 0x603   :  { %3906 = vmatprep.subr.mxu1 %v5492_v29 }
 0x604   :  { %3907 = vmatpush3.msra.mxu1 %v5943_v12 }
 0x605   :  { %3908 = vmatprep.subr.mxu1 %v5492_v29 }
 0x606   :  { %3909 = vmatpush3.msra.mxu1 %v5944_v14 }
 0x607   :  { %3948 = vmatprep.subr.mxu1 %v5492_v29 }
 0x685   :  { %v1822_v39 = vpop.f32.mrf.mxu1 }
 0x687   :  { %v3772_v54 = vpop.f32.mrf.mxu1 }
 0x690   :  { %v1915_v25 = vpop.f32.mrf.mxu0 }
 0x691   :  { %v1916_v23 = vadd.f32 %v1915_v25, %v1822_v39  ;;  %v4303_v39 = vld [vmem:[#allocation8 + $0x28] sm:$0xff] }
 0x692   :  { %v3807_v21 = vpop.f32.mrf.mxu0 }
 0x693   :  { %v1919_v16 = vadd.f32 %v5480_v11, %v1916_v23 }
 0x695   :  { %4204 = vtanh.f32 %v1919_v16  ;;  %v4304_v16 = vld [vmem:[#allocation8 + $0x20] sm:$0xff] }
 0x6a2   :  { %v4205_v36 = vpop.eup %4204 }
 0x6a3   :  { %3876 = vmatmul.mubr.f32.vlgmr.msra.gmra.mxu0 %v4205_v36 }
 0x6a4   :  { %3914 = vmatpush3.msra.mxu0 %v4293_v40  ;;  %3945 = vmatprep.mubr.msk.f32.mxu0 %vm4462_vm0, %v5492_v29 }
 0x6a5   :  { %v1987_v57 = vpop.f32.mrf.mxu1  ;;  %3915 = vmatprep.subr.mxu0 %v5492_v29 }
 0x6a6   :  { %v1992_v58 = vrot.slane %v1987_v57, 2  ;;  %v1993_v59 = vrot.slane %v1987_v57, 3  ;;  %v1994_v60 = vrot.slane %v1987_v57, 4  ;;  %v1995_v61 = vrot.slane %v1987_v57, 5  ;;  %3916 = vmatpush3.msra.mxu0 %v4294_v62 }
 0x6a7   :  { %v1996_v63 = vrot.slane %v1987_v57, 6  ;;  %v3842_v1 = vpop.f32.mrf.mxu1  ;;  %v1997_v3 = vrot.slane %v1987_v57, 7  ;;  %3917 = vmatprep.subr.mxu0 %v5492_v29  ;;  %v1998_v37 = vrot.slane %v1987_v57, 1  ;;  %v2013_v32 = vadd.f32 %v1987_v57, %v4829_v20 }
 0x6a8   :  { %v2007_v5 = vadd.f32 %v1992_v58, %v4812_v34  ;;  %v2008_v7 = vadd.f32 %v1993_v59, %v5921_v2  ;;  %v2009_v50 = vadd.f32 %v1994_v60, %v4817_v0  ;;  %3918 = vmatpush3.msra.mxu0 %v4295_v24  ;;  %v2010_v30 = vadd.f32 %v1995_v61, %v4814_v41  ;;  %v4305_v61 = vld [vmem:[#allocation8 + $0x18] sm:$0xff]  ;;  %v4307_v24 = vld [vmem:[#allocation8 + $0x8] sm:$0xff] }
 0x6a9   :  { %3919 = vmatprep.subr.mxu0 %v5492_v29  ;;  %v2011_v9 = vadd.f32 %v1996_v63, %v4823_v26  ;;  %v2012_v47 = vadd.f32 %v1997_v3, %v4820_v28  ;;  %v2014_v4 = vadd.f32 %v1998_v37, %v4826_v45 }
 0x6aa   :  { %4206 = vtanh.f32 %v2007_v5  ;;  %3920 = vmatpush3.msra.mxu0 %v4296_v56  ;;  %v4306_v5 = vld [vmem:[#allocation8 + $0x10] sm:$0xff]  ;;  %v4309_v56 = vld [vmem:[#allocation11 + $0x78] sm:$0xff] }
 0x6ab   :  { %4208 = vtanh.f32 %v2008_v7  ;;  %3921 = vmatprep.subr.mxu0 %v5492_v29 }
 0x6ac   :  { %4210 = vtanh.f32 %v2009_v50  ;;  %3922 = vmatpush3.msra.mxu0 %v4297_v55  ;;  %v4312_v55 = vld [vmem:[#allocation11 + $0x60] sm:$0xff] }
 0x6ad   :  { %4212 = vtanh.f32 %v2010_v30  ;;  %3923 = vmatprep.subr.mxu0 %v5492_v29 }
 0x6ae   :  { %4214 = vtanh.f32 %v2011_v9  ;;  %3924 = vmatpush3.msra.mxu0 %v4298_v49  ;;  %v4308_v9 = vld [vmem:[#allocation8] sm:$0xff] }
 0x6af   :  { %4216 = vtanh.f32 %v2012_v47  ;;  %3925 = vmatprep.subr.mxu0 %v5492_v29  ;;  %v4310_v47 = vld [vmem:[#allocation11 + $0x70] sm:$0xff] }
 0x6b0   :  { %4218 = vtanh.f32 %v2014_v4  ;;  %3926 = vmatpush3.msra.mxu0 %v4299_v18  ;;  %v4311_v4 = vld [vmem:[#allocation11 + $0x68] sm:$0xff] }
 0x6b1   :  { %4220 = vtanh.f32 %v2013_v32  ;;  %3927 = vmatprep.subr.mxu0 %v5492_v29  ;;  %v4313_v32 = vld [vmem:[#allocation11 + $0x58] sm:$0xff] }
 0x6b2   :  { %3928 = vmatpush3.msra.mxu0 %v4300_v33 }
 0x6b3   :  { %3929 = vmatprep.subr.mxu0 %v5492_v29 }
 0x6b4   :  { %3930 = vmatpush3.msra.mxu0 %v4301_v13 }
 0x6b5   :  { %3931 = vmatprep.subr.mxu0 %v5492_v29 }
 0x6b6   :  { %3932 = vmatpush3.msra.mxu0 %v4302_v48 }
 0x6b7   :  { %v4207_v15 = vpop.eup %4206  ;;  %3933 = vmatprep.subr.mxu0 %v5492_v29 }
 0x6b8   :  { %v4209_v43 = vpop.eup %4208  ;;  %v2101_v31 = vrot.slane %v4207_v15, 6  ;;  %3934 = vmatpush3.msra.mxu0 %v4303_v39 }
 0x6b9   :  { %v4211_v22 = vpop.eup %4210  ;;  %v2102_v54 = vrot.slane %v4209_v43, 5  ;;  %3935 = vmatprep.subr.mxu0 %v5492_v29 }
 0x6ba   :  { %v4213_v25 = vpop.eup %4212  ;;  %v2104_v23 = vrot.slane %v4211_v22, 4  ;;  %3936 = vmatpush3.msra.mxu0 %v4304_v16 }
 0x6bb   :  { %v4215_v21 = vpop.eup %4214  ;;  %v2103_v36 = vsel %vm487_vm1, %v2102_v54, %v2101_v31  ;;  %v2106_v40 = vrot.slane %v4213_v25, 3  ;;  %3937 = vmatprep.subr.mxu0 %v5492_v29 }
 0x6bc   :  { %v4217_v57 = vpop.eup %4216  ;;  %v2105_v58 = vsel %vm490_vm2, %v2104_v23, %v2103_v36  ;;  %v2108_v59 = vrot.slane %v4215_v21, 2  ;;  %3938 = vmatpush3.msra.mxu0 %v4305_v61 }
 0x6bd   :  { %v4219_v60 = vpop.eup %4218  ;;  %v2107_v62 = vsel %vm493_vm3, %v2106_v40, %v2105_v58  ;;  %v2110_v63 = vrot.slane %v4217_v57, 1  ;;  %3939 = vmatprep.subr.mxu0 %v5492_v29 }
 0x6be   :  { %v2109_v1 = vsel %vm496_vm4, %v2108_v59, %v2107_v62  ;;  %v4221_v3 = vpop.eup %4220  ;;  %3940 = vmatpush3.msra.mxu0 %v4306_v5  ;;  %v2113_v50 = vrot.slane %v4219_v60, 7 }
 0x6bf   :  { %v2111_v7 = vsel %vm499_vm5, %v2110_v63, %v2109_v1  ;;  %3941 = vmatprep.subr.mxu0 %v5492_v29 }
 0x6c0   :  { %v2112_v37 = vsel %vm502_vm6, %v4221_v3, %v2111_v7  ;;  %3942 = vmatpush3.msra.mxu0 %v4307_v24 }
 0x6c1   :  { %v2114_v30 = vsel %vm505_vm7, %v2113_v50, %v2112_v37  ;;  %3943 = vmatprep.subr.mxu0 %v5492_v29 }
 0x6c2   :  { %3911 = vmatmul.mubr.f32.vlgmr.msra.gmra.mxu1 %v2114_v30  ;;  %3944 = vmatpush3.msra.mxu0 %v4308_v9 }
 0x6c3   :  { %3949 = vmatpush3.msra.mxu1 %v4309_v56  ;;  %3946 = vmatmul.mubr.f32.vlgmr.msra.gmra.mxu0 %v2114_v30 }
 0x6c4   :  { %3950 = vmatprep.subr.mxu1 %v5492_v29  ;;  %3983 = vmatprep.subr.mxu0 %v5492_v29 }
 0x6c5   :  { %3951 = vmatpush3.msra.mxu1 %v4310_v47  ;;  %3984 = vmatpush3.msra.mxu0 %v5288_v44  ;;  %v4314_v44 = vld [vmem:[#allocation11 + $0x50] sm:$0xff] }
 0x6c6   :  { %3952 = vmatprep.subr.mxu1 %v5492_v29  ;;  %3985 = vmatprep.subr.mxu0 %v5492_v29 }
 0x6c7   :  { %3953 = vmatpush3.msra.mxu1 %v4311_v4  ;;  %3986 = vmatpush3.msra.mxu0 %v5294_v52  ;;  %v4315_v52 = vld [vmem:[#allocation11 + $0x48] sm:$0xff] }
 0x6c8   :  { %3954 = vmatprep.subr.mxu1 %v5492_v29  ;;  %3987 = vmatprep.subr.mxu0 %v5492_v29 }
 0x6c9   :  { %3955 = vmatpush3.msra.mxu1 %v4312_v55  ;;  %3988 = vmatpush3.msra.mxu0 %v5300_v51  ;;  %v4316_v51 = vld [vmem:[#allocation11 + $0x40] sm:$0xff] }
 0x6ca   :  { %3956 = vmatprep.subr.mxu1 %v5492_v29  ;;  %3989 = vmatprep.subr.mxu0 %v5492_v29 }
 0x6cb   :  { %3957 = vmatpush3.msra.mxu1 %v4313_v32  ;;  %3990 = vmatpush3.msra.mxu0 %v5306_v53  ;;  %v4317_v53 = vld [vmem:[#allocation11 + $0x38] sm:$0xff] }
 0x6cc   :  { %3958 = vmatprep.subr.mxu1 %v5492_v29  ;;  %3991 = vmatprep.subr.mxu0 %v5492_v29 }
 0x6cd   :  { %3959 = vmatpush3.msra.mxu1 %v4314_v44  ;;  %3992 = vmatpush3.msra.mxu0 %v5312_v19  ;;  %v4318_v19 = vld [vmem:[#allocation11 + $0x30] sm:$0xff] }
 0x6ce   :  { %3960 = vmatprep.subr.mxu1 %v5492_v29  ;;  %3993 = vmatprep.subr.mxu0 %v5492_v29 }
 0x6cf   :  { %3961 = vmatpush3.msra.mxu1 %v4315_v52  ;;  %3994 = vmatpush3.msra.mxu0 %v5318_v38  ;;  %v4319_v38 = vld [vmem:[#allocation11 + $0x28] sm:$0xff] }
 0x6d0   :  { %3962 = vmatprep.subr.mxu1 %v5492_v29  ;;  %3995 = vmatprep.subr.mxu0 %v5492_v29 }
 0x6d1   :  { %3963 = vmatpush3.msra.mxu1 %v4316_v51  ;;  %3996 = vmatpush3.msra.mxu0 %v5322_v46  ;;  %v4320_v46 = vld [vmem:[#allocation11 + $0x20] sm:$0xff] }
 0x6d2   :  { %3964 = vmatprep.subr.mxu1 %v5492_v29  ;;  %3997 = vmatprep.subr.mxu0 %v5492_v29 }
 0x6d3   :  { %3965 = vmatpush3.msra.mxu1 %v4317_v53  ;;  %3998 = vmatpush3.msra.mxu0 %v5326_v42  ;;  %v4321_v42 = vld [vmem:[#allocation11 + $0x18] sm:$0xff] }
 0x6d4   :  { %3966 = vmatprep.subr.mxu1 %v5492_v29  ;;  %3999 = vmatprep.subr.mxu0 %v5492_v29 }
 0x6d5   :  { %3967 = vmatpush3.msra.mxu1 %v4318_v19  ;;  %4000 = vmatpush3.msra.mxu0 %v5330_v27  ;;  %v4322_v27 = vld [vmem:[#allocation11 + $0x10] sm:$0xff] }
 0x6d6   :  { %3968 = vmatprep.subr.mxu1 %v5492_v29  ;;  %4001 = vmatprep.subr.mxu0 %v5492_v29 }
 0x6d7   :  { %3969 = vmatpush3.msra.mxu1 %v4319_v38  ;;  %4002 = vmatpush3.msra.mxu0 %v5334_v17  ;;  %v4323_v17 = vld [vmem:[#allocation11 + $0x8] sm:$0xff] }
 0x6d8   :  { %3970 = vmatprep.subr.mxu1 %v5492_v29  ;;  %4003 = vmatprep.subr.mxu0 %v5492_v29 }
 0x6d9   :  { %3971 = vmatpush3.msra.mxu1 %v4320_v46  ;;  %4004 = vmatpush3.msra.mxu0 %v5939_v35  ;;  %v4324_v35 = vld [vmem:[#allocation11] sm:$0xff] }
 0x6da   :  { %3972 = vmatprep.subr.mxu1 %v5492_v29  ;;  %4005 = vmatprep.subr.mxu0 %v5492_v29 }
 0x6db   :  { %3973 = vmatpush3.msra.mxu1 %v4321_v42  ;;  %3980 = vmatprep.mubr.msk.f32.mxu1 %vm4462_vm0, %v5492_v29 }
 0x6dc   :  { %3974 = vmatprep.subr.mxu1 %v5492_v29  ;;  %4006 = vmatpush3.msra.mxu0 %v5940_v6 }
 0x6dd   :  { %3975 = vmatpush3.msra.mxu1 %v4322_v27  ;;  %4007 = vmatprep.subr.mxu0 %v5492_v29  ;;  %v2491_v27 = vld [vmem:[%s5854_s7 + $0x78] sm:$0xff] }
 0x6de   :  { %3976 = vmatprep.subr.mxu1 %v5492_v29  ;;  %4008 = vmatpush3.msra.mxu0 %v5941_v8 }
 0x6df   :  { %3977 = vmatpush3.msra.mxu1 %v4323_v17  ;;  %4009 = vmatprep.subr.mxu0 %v5492_v29 }
 0x6e0   :  { %3978 = vmatprep.subr.mxu1 %v5492_v29  ;;  %4010 = vmatpush3.msra.mxu0 %v5942_v10 }
 0x6e1   :  { %3979 = vmatpush3.msra.mxu1 %v4324_v35  ;;  %4011 = vmatprep.subr.mxu0 %v5492_v29 }
 0x6e2   :  { %4015 = vmatprep.mubr.msk.f32.mxu0 %vm4462_vm0, %v5492_v29  ;;  %4012 = vmatpush3.msra.mxu0 %v5943_v12 }
 0x6e3   :  { %4018 = vmatprep.subr.mxu1 %v5492_v29  ;;  %4013 = vmatprep.subr.mxu0 %v5492_v29 }
 0x6e4   :  { %4014 = vmatpush3.msra.mxu0 %v5944_v14 }
 0x6e5   :  { %4053 = vmatprep.subr.mxu0 %v5492_v29 }
 0x763   :  { %v2089_v6 = vpop.f32.mrf.mxu0 }
 0x765   :  { %v3877_v8 = vpop.f32.mrf.mxu0 }
 0x766   :  { %v2489_v8 = vld [vmem:[%s5854_s7 + $0x68] sm:$0xff] }
 0x782   :  { %v2182_v49 = vpop.f32.mrf.mxu1 }
 0x783   :  { %v2183_v18 = vadd.f32 %v2182_v49, %v2089_v6  ;;  %v2254_v10 = vpop.f32.mrf.mxu0  ;;  %v2490_v6 = vld [vmem:[%s5854_s7 + $0x70] sm:$0xff]  ;;  %v2488_v49 = vld [vmem:[%s5854_s7 + $0x60] sm:$0xff] }
 0x784   :  { %v3912_v33 = vpop.f32.mrf.mxu1  ;;  %v2259_v15 = vrot.slane %v2254_v10, 1  ;;  %v2260_v48 = vrot.slane %v2254_v10, 2  ;;  %v2261_v43 = vrot.slane %v2254_v10, 3  ;;  %v2262_v12 = vrot.slane %v2254_v10, 4 }
 0x785   :  { %v2186_v13 = vadd.f32 %v5480_v11, %v2183_v18  ;;  %v2263_v31 = vrot.slane %v2254_v10, 5  ;;  %v2264_v22 = vrot.slane %v2254_v10, 6  ;;  %v2265_v39 = vrot.slane %v2254_v10, 7  ;;  %v3947_v54 = vpop.f32.mrf.mxu0  ;;  %v2487_v18 = vld [vmem:[%s5854_s7 + $0x58] sm:$0xff]  ;;  %v2485_v33 = vld [vmem:[%s5854_s7 + $0x48] sm:$0xff] }
 0x786   :  { %v2274_v14 = vadd.f32 %v2259_v15, %v4812_v34  ;;  %v2275_v25 = vadd.f32 %v2260_v48, %v5921_v2  ;;  %v2276_v23 = vadd.f32 %v2261_v43, %v4817_v0  ;;  %v2277_v21 = vadd.f32 %v2262_v12, %v4814_v41  ;;  %v2507_v0 = vld [vmem:[%s5855_s8 + $0x78] sm:$0xff]  ;;  %v2482_v48 = vld [vmem:[%s5854_s7 + $0x30] sm:$0xff]  ;;  %v2481_v43 = vld [vmem:[%s5854_s7 + $0x28] sm:$0xff] }
 0x787   :  { %4222 = vtanh.f32 %v2186_v13  ;;  %v2278_v16 = vadd.f32 %v2263_v31, %v4823_v26  ;;  %v2279_v36 = vadd.f32 %v2264_v22, %v4820_v28  ;;  %v2280_v40 = vadd.f32 %v2265_v39, %v4829_v20  ;;  %v2506_v26 = vld [vmem:[%s5855_s8 + $0x70] sm:$0xff]  ;;  %v2484_v13 = vld [vmem:[%s5854_s7 + $0x40] sm:$0xff]  ;;  %v2483_v15 = vld [vmem:[%s5854_s7 + $0x38] sm:$0xff] }
 0x788   :  { %4224 = vtanh.f32 %v2274_v14  ;;  %v2281_v57 = vadd.f32 %v2254_v10, %v4826_v45  ;;  %v2486_v10 = vld [vmem:[%s5854_s7 + $0x50] sm:$0xff]  ;;  %v2480_v12 = vld [vmem:[%s5854_s7 + $0x20] sm:$0xff]  ;;  %v2479_v31 = vld [vmem:[%s5854_s7 + $0x18] sm:$0xff] }
 0x789   :  { %4226 = vtanh.f32 %v2275_v25  ;;  %v2478_v22 = vld [vmem:[%s5854_s7 + $0x10] sm:$0xff]  ;;  %v2477_v39 = vld [vmem:[%s5854_s7 + $0x8] sm:$0xff]  ;;  %v2476_v54 = vld [vmem:[%s5854_s7] sm:$0xff] }
 0x78a   :  { %4228 = vtanh.f32 %v2276_v23  ;;  %v2505_v14 = vld [vmem:[%s5855_s8 + $0x68] sm:$0xff]  ;;  %v2504_v25 = vld [vmem:[%s5855_s8 + $0x60] sm:$0xff]  ;;  %v2503_v23 = vld [vmem:[%s5855_s8 + $0x58] sm:$0xff] }
 0x78b   :  { %4230 = vtanh.f32 %v2277_v21  ;;  %v2502_v21 = vld [vmem:[%s5855_s8 + $0x50] sm:$0xff] }
 0x78c   :  { %4232 = vtanh.f32 %v2278_v16  ;;  %v2501_v16 = vld [vmem:[%s5855_s8 + $0x48] sm:$0xff] }
 0x78d   :  { %4234 = vtanh.f32 %v2279_v36  ;;  %v2500_v36 = vld [vmem:[%s5855_s8 + $0x40] sm:$0xff] }
 0x78e   :  { %4236 = vtanh.f32 %v2280_v40  ;;  %v2499_v40 = vld [vmem:[%s5855_s8 + $0x38] sm:$0xff] }
 0x78f   :  { %4238 = vtanh.f32 %v2281_v57  ;;  %v2498_v57 = vld [vmem:[%s5855_s8 + $0x30] sm:$0xff] }
 0x794   :  { %v4223_v34 = vpop.eup %4222 }
 0x795   :  { %3981 = vmatmul.mubr.f32.vlgmr.msra.gmra.mxu1 %v4223_v34  ;;  %v4225_v28 = vpop.eup %4224  ;;  %v2496_v34 = vld [vmem:[%s5855_s8 + $0x20] sm:$0xff] }
 0x796   :  { %4019 = vmatpush3.msra.mxu1 %v2507_v0  ;;  %4050 = vmatprep.mubr.msk.f32.mxu1 %vm4462_vm0, %v5492_v29  ;;  %v4227_v20 = vpop.eup %4226  ;;  %2470 = vst [vmem:[#allocation2 - $0x7] sm:$0x80] %v4225_v28  ;;  %v2368_v41 = vrot.slane %v4225_v28, 7  ;;  %v2497_v0 = vld [vmem:[%s5855_s8 + $0x28] sm:$0xff]  ;;  %v2494_v28 = vld [vmem:[%s5855_s8 + $0x10] sm:$0xff] }
 0x797   :  { %4020 = vmatprep.subr.mxu1 %v5492_v29  ;;  %v4229_v45 = vpop.eup %4228  ;;  %v2455_v2 = vrot.slane %v4227_v20, 7  ;;  %v2369_v58 = vrot.slane %v4227_v20, 6  ;;  %v2493_v20 = vld [vmem:[%s5855_s8 + $0x8] sm:$0xff] }
 0x798   :  { %4021 = vmatpush3.msra.mxu1 %v2506_v26  ;;  %v4231_v59 = vpop.eup %4230  ;;  %v2456_v60 = vrot.slane %v4229_v45, 6  ;;  %v2371_v61 = vrot.slane %v4229_v45, 5  ;;  %v2495_v26 = vld [vmem:[%s5855_s8 + $0x18] sm:$0xff] }
 0x799   :  { %4022 = vmatprep.subr.mxu1 %v5492_v29  ;;  %v4233_v62 = vpop.eup %4232  ;;  %v2458_v63 = vrot.slane %v4231_v59, 5  ;;  %v2370_v1 = vsel %vm487_vm1, %v2369_v58, %v2368_v41  ;;  %v2373_v3 = vrot.slane %v4231_v59, 4  ;;  %v2492_v41 = vld [vmem:[%s5855_s8] sm:$0xff] }
 0x79a   :  { %v4235_v5 = vpop.eup %4234  ;;  %v2457_v7 = vsel %vm487_vm1, %v2456_v60, %v2455_v2  ;;  %v2460_v50 = vrot.slane %v4233_v62, 4  ;;  %v2372_v37 = vsel %vm490_vm2, %v2371_v61, %v2370_v1  ;;  %v2375_v24 = vrot.slane %v4233_v62, 3  ;;  %4023 = vmatpush3.msra.mxu1 %v2505_v14 }
 0x79b   :  { %v4237_v30 = vpop.eup %4236  ;;  %v2459_v9 = vsel %vm490_vm2, %v2458_v63, %v2457_v7  ;;  %v2462_v56 = vrot.slane %v4235_v5, 3  ;;  %v2374_v47 = vsel %vm493_vm3, %v2373_v3, %v2372_v37  ;;  %v2377_v4 = vrot.slane %v4235_v5, 2  ;;  %4024 = vmatprep.subr.mxu1 %v5492_v29  ;;  %v2667_v5 = vld [vmem:[%s5856_s9] ss:$0 sm:$0xff] }
 0x79c   :  { %v4239_v55 = vpop.eup %4238  ;;  %v2461_v32 = vsel %vm493_vm3, %v2460_v50, %v2459_v9  ;;  %v2464_v44 = vrot.slane %v4237_v30, 2  ;;  %v2376_v52 = vsel %vm496_vm4, %v2375_v24, %v2374_v47  ;;  %v2379_v51 = vrot.slane %v4237_v30, 1  ;;  %4025 = vmatpush3.msra.mxu1 %v2504_v25 }
 0x79d   :  { %v2463_v53 = vsel %vm496_vm4, %v2462_v56, %v2461_v32  ;;  %v2466_v19 = vrot.slane %v4239_v55, 1  ;;  %v2378_v38 = vsel %vm499_vm5, %v2377_v4, %v2376_v52  ;;  %4026 = vmatprep.subr.mxu1 %v5492_v29 }
 0x79e   :  { %v2465_v46 = vsel %vm499_vm5, %v2464_v44, %v2463_v53  ;;  %v2380_v42 = vsel %vm502_vm6, %v2379_v51, %v2378_v38  ;;  %4027 = vmatpush3.msra.mxu1 %v2503_v23 }
 0x79f   :  { %v2467_v17 = vsel %vm502_vm6, %v2466_v19, %v2465_v46  ;;  %v2381_v35 = vsel %vm505_vm7, %v4239_v55, %v2380_v42  ;;  %4028 = vmatprep.subr.mxu1 %v5492_v29 }
 0x7a0   :  { %2471 = vst [vmem:[#allocation2 + $0x1] sm:$0x7f] %v2467_v17  ;;  %4016 = vmatmul.mubr.f32.vlgmr.msra.gmra.mxu0 %v2381_v35  ;;  %4029 = vmatpush3.msra.mxu1 %v2502_v21 }
 0x7a1   :  { %4054 = vmatpush3.msra.mxu0 %v2491_v27  ;;  %4085 = vmatprep.mubr.msk.f32.mxu0 %vm4462_vm0, %v5492_v29 }
 0x7a2   :  { %4055 = vmatprep.subr.mxu0 %v5492_v29  ;;  %4030 = vmatprep.subr.mxu1 %v5492_v29 }
 0x7a3   :  { %4056 = vmatpush3.msra.mxu0 %v2490_v6  ;;  %4031 = vmatpush3.msra.mxu1 %v2501_v16 }
 0x7a4   :  { %4057 = vmatprep.subr.mxu0 %v5492_v29  ;;  %4032 = vmatprep.subr.mxu1 %v5492_v29 }
 0x7a5   :  { %4058 = vmatpush3.msra.mxu0 %v2489_v8  ;;  %4033 = vmatpush3.msra.mxu1 %v2500_v36 }
 0x7a6   :  { %4059 = vmatprep.subr.mxu0 %v5492_v29  ;;  %4034 = vmatprep.subr.mxu1 %v5492_v29 }
 0x7a7   :  { %4060 = vmatpush3.msra.mxu0 %v2488_v49  ;;  %4035 = vmatpush3.msra.mxu1 %v2499_v40 }
 0x7a8   :  { %4061 = vmatprep.subr.mxu0 %v5492_v29  ;;  %4036 = vmatprep.subr.mxu1 %v5492_v29 }
 0x7a9   :  { %4062 = vmatpush3.msra.mxu0 %v2487_v18  ;;  %4037 = vmatpush3.msra.mxu1 %v2498_v57 }
 0x7aa   :  { %4063 = vmatprep.subr.mxu0 %v5492_v29  ;;  %4038 = vmatprep.subr.mxu1 %v5492_v29 }
 0x7ab   :  { %4064 = vmatpush3.msra.mxu0 %v2486_v10  ;;  %4039 = vmatpush3.msra.mxu1 %v2497_v0 }
 0x7ac   :  { %4065 = vmatprep.subr.mxu0 %v5492_v29  ;;  %4040 = vmatprep.subr.mxu1 %v5492_v29 }
 0x7ad   :  { %4066 = vmatpush3.msra.mxu0 %v2485_v33  ;;  %4041 = vmatpush3.msra.mxu1 %v2496_v34 }
 0x7ae   :  { %4067 = vmatprep.subr.mxu0 %v5492_v29  ;;  %4042 = vmatprep.subr.mxu1 %v5492_v29 }
 0x7af   :  { %4068 = vmatpush3.msra.mxu0 %v2484_v13  ;;  %4043 = vmatpush3.msra.mxu1 %v2495_v26 }
 0x7b0   :  { %4069 = vmatprep.subr.mxu0 %v5492_v29  ;;  %4044 = vmatprep.subr.mxu1 %v5492_v29 }
 0x7b1   :  { %4070 = vmatpush3.msra.mxu0 %v2483_v15  ;;  %4045 = vmatpush3.msra.mxu1 %v2494_v28 }
 0x7b2   :  { %4071 = vmatprep.subr.mxu0 %v5492_v29  ;;  %4046 = vmatprep.subr.mxu1 %v5492_v29 }
 0x7b3   :  { %4072 = vmatpush3.msra.mxu0 %v2482_v48  ;;  %4047 = vmatpush3.msra.mxu1 %v2493_v20 }
 0x7b4   :  { %4073 = vmatprep.subr.mxu0 %v5492_v29  ;;  %4048 = vmatprep.subr.mxu1 %v5492_v29 }
 0x7b5   :  { %4074 = vmatpush3.msra.mxu0 %v2481_v43  ;;  %4049 = vmatpush3.msra.mxu1 %v2492_v41 }
 0x7b6   :  { %4075 = vmatprep.subr.mxu0 %v5492_v29 }
 0x7b7   :  { %4076 = vmatpush3.msra.mxu0 %v2480_v12 }
 0x7b8   :  { %4077 = vmatprep.subr.mxu0 %v5492_v29 }
 0x7b9   :  { %4078 = vmatpush3.msra.mxu0 %v2479_v31 }
 0x7ba   :  { %4079 = vmatprep.subr.mxu0 %v5492_v29 }
 0x7bb   :  { %4080 = vmatpush3.msra.mxu0 %v2478_v22 }
 0x7bc   :  { %4081 = vmatprep.subr.mxu0 %v5492_v29 }
 0x7bd   :  { %4082 = vmatpush3.msra.mxu0 %v2477_v39 }
 0x7be   :  { %4083 = vmatprep.subr.mxu0 %v5492_v29 }
 0x7bf   :  { %4084 = vmatpush3.msra.mxu0 %v2476_v54 }
 0x7c0   :  { %4086 = vmatmul.mubr.f32.vlgmr.msra.gmra.mxu0 %v2381_v35 }
 0x855   :  { %v2356_v45 = vpop.f32.mrf.mxu1 }
 0x857   :  { %v3982_v2 = vpop.f32.mrf.mxu1 }
 0x860   :  { %v2449_v58 = vpop.f32.mrf.mxu0 }
 0x861   :  { %v2450_v59 = vadd.f32 %v2449_v58, %v2356_v45 }
 0x862   :  { %v4017_v60 = vpop.f32.mrf.mxu0 }
 0x863   :  { %v2453_v61 = vadd.f32 %v5480_v11, %v2450_v59 }
 0x865   :  { %4240 = vtanh.f32 %v2453_v61 }
 0x872   :  { %v4241_v62 = vpop.eup %4240 }
 0x873   :  { %4051 = vmatmul.mubr.f32.vlgmr.msra.gmra.mxu1 %v4241_v62 }
 0x880   :  { %v2644_v63 = vpop.f32.mrf.mxu0 }
 0x882   :  { %v4087_v1 = vpop.f32.mrf.mxu0 }
 0x933   :  { %v2574_v3 = vpop.f32.mrf.mxu1 }
 0x934   :  { %v2645_v7 = vadd.f32 %v2644_v63, %v2574_v3 }
 0x935   :  { %v4052_v29 = vpop.f32.mrf.mxu1 }
 0x936   :  { %v2655_v50 = vadd.f32 %v2667_v5, %v2645_v7 }
 0x938   :  { %2656 = vst [vmem:[%s5857_s10] sm:$0xff] %v2655_v50 }
 0x939   :  { %2661 = vsyncpa [#allocation5], 1 }
 0x93a   :  { %2662 = vsyncpa [#allocation7], 1 }
 0x93b   :  { %2663 = vsyncpa [#allocation10], 1 }
 0x93c   :  { %2664 = vsyncpa [#allocation13], 1 }

</bundles_post_ra>
